<compile_context>
chip_gen: v7x
topology: tpu7x:2x2x1
jax: 0.10.0
libtpu: 0.0.40
codegen_flags: <defaults>
</compile_context>

<pallas_src>
import functools

import jax
import jax.numpy as jnp
from jax import lax
from jax.experimental import pallas as pl
from jax.experimental.pallas import tpu as pltpu

EPS = 1e-5  # nn.GroupNorm default


def resblock_kernel(x_ref, w1_ref, w2_ref, pcv_ref, o_ref, *, seq_len, b_tile):
    x = x_ref[...]                                # (C, L) f32, L = b_tile * seq_len
    C, L = x.shape
    gs = 8                                        # GroupNorm(C // 8, C) -> group size 8
    G = C // gs
    T = seq_len

    w1 = w1_ref[...]                              # (3C, C) bf16, rows [k=0; k=1; k=2]
    w2 = w2_ref[...]                              # (3C, C) bf16
    pcv = pcv_ref[...]                            # (C, 6) f32: [b1, g1, be1, b2, g2, be2]
    b1, g1, be1 = pcv[:, 0:1], pcv[:, 1:2], pcv[:, 2:3]
    b2, g2, be2 = pcv[:, 3:4], pcv[:, 4:5], pcv[:, 5:6]

    # Per-sample boundary masks (samples are contiguous length-T lane segments);
    # built once, reused by both convs.
    t_mod = lax.broadcasted_iota(jnp.int32, (1, L), 1) % T
    m_left = t_mod >= 1                           # x[t-1] exists within the same sample
    m_right = t_mod <= T - 2                      # x[t+1] exists within the same sample

    def conv(inp, w_stack, bias):
        # 'same' conv, k=3, p=1, fused output-side:
        #   U = [W0; W1; W2] @ x  (one MXU call, bf16 operands, f32 accumulation)
        #   y[t] = U0[t-1] + U1[t] + U2[t+1] + bias   (per-sample boundaries masked)
        u = jnp.dot(w_stack, inp.astype(w_stack.dtype),
                    preferred_element_type=jnp.float32)       # (3C, L) f32
        y = u[C:2 * C] + bias
        y = y + jnp.where(m_left, pltpu.roll(u[0:C], shift=1, axis=1), 0.0)
        y = y + jnp.where(m_right, pltpu.roll(u[2 * C:3 * C], shift=L - 1, axis=1), 0.0)
        return y

    def group_norm(y, gamma, beta):
        # One-pass stats per (group, sample); all math stays in f32.
        yg = y.reshape(G, gs, b_tile, T)
        n = float(gs * T)
        s = jnp.sum(yg, axis=(1, 3), keepdims=True)           # (G, 1, b_tile, 1)
        sq = jnp.sum(yg * yg, axis=(1, 3), keepdims=True)
        mean = s / n
        var = jnp.maximum(sq / n - mean * mean, 0.0)          # biased variance
        yn = (yg - mean) * lax.rsqrt(var + EPS)
        return yn.reshape(C, L) * gamma + beta

    h = jnp.maximum(group_norm(conv(x, w1, b1), g1, be1), 0.0)   # ReLU
    h = group_norm(conv(h, w2, b2), g2, be2)
    o_ref[...] = jnp.maximum(h + x, 0.0)                          # residual + ReLU (f32)


def _pick_b_tile(B, T, target_lanes=512, min_steps=2):
    """Largest divisor of B with b_tile*T <= target_lanes; then back off (keeping
    lane width >= 128 when possible) so the grid has at least `min_steps` steps."""
    bt = 1
    for cand in range(1, B + 1):
        if B % cand == 0 and cand * T <= max(target_lanes, T):
            bt = cand
    while bt > 1 and B // bt < min_steps:
        nxt = bt // 2
        if nxt >= 1 and B % nxt == 0 and nxt * T >= 128:
            bt = nxt
        else:
            break
    return bt


def resblock_pallas(x, params, *, mxu_dtype=jnp.bfloat16, target_lanes=512):
    (w1, b1, g1, be1, w2, b2, g2, be2) = params
    B, C, T = x.shape
    assert C % 8 == 0, "GroupNorm(C // 8, C) requires C divisible by 8"

    b_tile = _pick_b_tile(B, T, target_lanes)
    nb = B // b_tile
    L = b_tile * T

    # Output-side tap-fusion weights: rows [k=0; k=1; k=2], shape (3C, C), bf16
    # MXU operands.  PyTorch Conv1d weight is (C_out, C_in, K).
    w1s = jnp.concatenate([w1[:, :, 0], w1[:, :, 1], w1[:, :, 2]], axis=0).astype(mxu_dtype)
    w2s = jnp.concatenate([w2[:, :, 0], w2[:, :, 1], w2[:, :, 2]], axis=0).astype(mxu_dtype)
    # Pack all per-channel vectors into one small f32 buffer.
    pcv = jnp.stack([b1, g1, be1, b2, g2, be2], axis=1)        # (C, 6)

    # Lane-dense layout plumbing (wrapper-side, pure XLA reshape/transpose):
    # (B, C, T) -> (nb, C, b_tile*T); each sample is a contiguous T-lane segment.
    xr = x.reshape(nb, b_tile, C, T).transpose(0, 2, 1, 3).reshape(nb, C, L)

    kernel = functools.partial(resblock_kernel, seq_len=T, b_tile=b_tile)

    out = pl.pallas_call(
        kernel,
        out_shape=jax.ShapeDtypeStruct((nb, C, L), jnp.float32),
        grid=(nb,),
        in_specs=[
            pl.BlockSpec((None, C, L), lambda i: (i, 0, 0)),   # one sample-block per step
            pl.BlockSpec((3 * C, C), lambda i: (0, 0)),        # w1 stack (resident)
            pl.BlockSpec((3 * C, C), lambda i: (0, 0)),        # w2 stack (resident)
            pl.BlockSpec((C, 6), lambda i: (0, 0)),            # packed per-channel vectors
        ],
        out_specs=pl.BlockSpec((None, C, L), lambda i: (i, 0, 0)),
        compiler_params=pltpu.CompilerParams(
            dimension_semantics=("parallel",),                 # shard sample-blocks across TCs
            vmem_limit_bytes=64 * 1024 * 1024,
        ),
    )(xr, w1s, w2s, pcv)

    # Undo the lane-dense layout: (nb, C, L) -> (B, C, T).
    return out.reshape(nb, C, b_tile, T).transpose(0, 2, 1, 3).reshape(B, C, T)


def resblock_ref(x, params):
    """Pure-JAX f32 reference matching the PyTorch module semantics."""
    (w1, b1, g1, be1, w2, b2, g2, be2) = params
    C = x.shape[1]
    G = C // 8

    def conv(inp, w, b):
        y = lax.conv_general_dilated(inp, w, window_strides=(1,),
                                     padding=((1, 1),),
                                     dimension_numbers=('NCW', 'OIW', 'NCW'))
        return y + b[None, :, None]

    def gn(y, gamma, beta):
        B, Cc, T = y.shape
        yg = y.reshape(B, G, Cc // G, T)
        m = yg.mean(axis=(2, 3), keepdims=True)
        v = ((yg - m) ** 2).mean(axis=(2, 3), keepdims=True)
        yn = ((yg - m) / jnp.sqrt(v + EPS)).reshape(B, Cc, T)
        return yn * gamma[None, :, None] + beta[None, :, None]

    h = jax.nn.relu(gn(conv(x, w1, b1), g1, be1))
    h = gn(conv(h, w2, b2), g2, be2)
    return jax.nn.relu(h + x)


if __name__ == "__main__":
    B, C, T = 16, 16, 16   # chan=16 -> GroupNorm(2, 16); B_tile=8 -> 128-lane slabs, grid=(2,)
    key = jax.random.PRNGKey(0)
    ks = jax.random.split(key, 9)

    x = jax.random.normal(ks[0], (B, C, T), dtype=jnp.float32)
    # Deterministic synthetic parameters (PyTorch Conv1d weight shape: (C, C, 3)).
    w1 = 0.1 * jax.random.normal(ks[1], (C, C, 3), dtype=jnp.float32)
    b1 = 0.05 * jax.random.normal(ks[2], (C,), dtype=jnp.float32)
    g1 = 1.0 + 0.1 * jax.random.normal(ks[3], (C,), dtype=jnp.float32)
    be1 = 0.1 * jax.random.normal(ks[4], (C,), dtype=jnp.float32)
    w2 = 0.1 * jax.random.normal(ks[5], (C, C, 3), dtype=jnp.float32)
    b2 = 0.05 * jax.random.normal(ks[6], (C,), dtype=jnp.float32)
    g2 = 1.0 + 0.1 * jax.random.normal(ks[7], (C,), dtype=jnp.float32)
    be2 = 0.1 * jax.random.normal(ks[8], (C,), dtype=jnp.float32)
    params = (w1, b1, g1, be1, w2, b2, g2, be2)

    out = jax.block_until_ready(resblock_pallas(x, params))

    ref = resblock_ref(x, params)
    err = float(jnp.max(jnp.abs(out - ref)))
    # Tolerance reflects bf16 MXU operands (f32 accumulation) vs. the pure-f32 reference.
    assert err < 5e-2, f"mismatch vs reference: max abs err {err}"

    print("KERNEL_OK")
</pallas_src>

<mosaic_0001>
module attributes {stable_mosaic.version = 11 : i64} {
  func.func @resblock_kernel(%arg0: i32, %arg1: memref<1x16x128xf32, #tpu.memory_space<vmem>>, %arg2: memref<48x16xbf16, #tpu.memory_space<vmem>>, %arg3: memref<48x16xbf16, #tpu.memory_space<vmem>>, %arg4: memref<16x6xf32, #tpu.memory_space<vmem>>, %arg5: memref<1x16x128xf32, #tpu.memory_space<vmem>>) attributes {dimension_semantics = [#tpu.dimension_semantics<parallel>], iteration_bounds = array<i64: 2>, scalar_prefetch = 0 : i64, scratch_operands = 0 : i64, tpu.core_type = #tpu.core_type<tc>, window_params = [{transform_indices = @transform_0, window_bounds = array<i64: 1, 16, 128>}, {pipeline_mode = #tpu.pipeline_mode<synchronous>, transform_indices = @transform_1, window_bounds = array<i64: 48, 16>}, {pipeline_mode = #tpu.pipeline_mode<synchronous>, transform_indices = @transform_2, window_bounds = array<i64: 48, 16>}, {pipeline_mode = #tpu.pipeline_mode<synchronous>, transform_indices = @transform_3, window_bounds = array<i64: 16, 6>}, {transform_indices = @transform_4, window_bounds = array<i64: 1, 16, 128>}]} {
    %c0 = arith.constant 0 : index
    %c0_0 = arith.constant 0 : index
    %c0_1 = arith.constant 0 : index
    %0 = vector.load %arg1[%c0, %c0_0, %c0_1] : memref<1x16x128xf32, #tpu.memory_space<vmem>>, vector<1x16x128xf32>
    %1 = vector.shape_cast %0 : vector<1x16x128xf32> to vector<16x128xf32>
    %c0_2 = arith.constant 0 : index
    %c0_3 = arith.constant 0 : index
    %2 = vector.load %arg2[%c0_2, %c0_3] : memref<48x16xbf16, #tpu.memory_space<vmem>>, vector<48x16xbf16>
    %c0_4 = arith.constant 0 : index
    %c0_5 = arith.constant 0 : index
    %3 = vector.load %arg3[%c0_4, %c0_5] : memref<48x16xbf16, #tpu.memory_space<vmem>>, vector<48x16xbf16>
    %c0_6 = arith.constant 0 : index
    %c0_7 = arith.constant 0 : index
    %4 = vector.load %arg4[%c0_6, %c0_7] : memref<16x6xf32, #tpu.memory_space<vmem>>, vector<16x6xf32>
    %5 = vector.extract_strided_slice %4 {offsets = [0, 0], sizes = [16, 1], strides = [1, 1]} : vector<16x6xf32> to vector<16x1xf32>
    %6 = vector.extract_strided_slice %4 {offsets = [0, 1], sizes = [16, 1], strides = [1, 1]} : vector<16x6xf32> to vector<16x1xf32>
    %7 = vector.extract_strided_slice %4 {offsets = [0, 2], sizes = [16, 1], strides = [1, 1]} : vector<16x6xf32> to vector<16x1xf32>
    %8 = vector.extract_strided_slice %4 {offsets = [0, 3], sizes = [16, 1], strides = [1, 1]} : vector<16x6xf32> to vector<16x1xf32>
    %9 = vector.extract_strided_slice %4 {offsets = [0, 4], sizes = [16, 1], strides = [1, 1]} : vector<16x6xf32> to vector<16x1xf32>
    %10 = vector.extract_strided_slice %4 {offsets = [0, 5], sizes = [16, 1], strides = [1, 1]} : vector<16x6xf32> to vector<16x1xf32>
    %11 = tpu.iota {dimensions = array<i32: 1>} : vector<1x128xi32>
    %c16_i32 = arith.constant 16 : i32
    %c0_i32 = arith.constant 0 : i32
    %12 = arith.cmpi eq, %c16_i32, %c0_i32 : i32
    %c1_i32 = arith.constant 1 : i32
    %13 = arith.select %12, %c1_i32, %c16_i32 : i32
    %14 = vector.broadcast %13 : i32 to vector<1x128xi32>
    %15 = arith.remsi %11, %14 : vector<1x128xi32>
    %c0_i32_8 = arith.constant 0 : i32
    %16 = vector.broadcast %c0_i32_8 : i32 to vector<1x128xi32>
    %17 = arith.cmpi ne, %15, %16 : vector<1x128xi32>
    %c0_i32_9 = arith.constant 0 : i32
    %18 = vector.broadcast %c0_i32_9 : i32 to vector<1x128xi32>
    %19 = arith.cmpi slt, %15, %18 : vector<1x128xi32>
    %c0_i32_10 = arith.constant 0 : i32
    %20 = arith.cmpi slt, %13, %c0_i32_10 : i32
    %21 = vector.broadcast %20 : i1 to vector<1x128xi1>
    %22 = vector.broadcast %21 : vector<1x128xi1> to vector<1x128xi1>
    %23 = arith.xori %19, %22 : vector<1x128xi1>
    %24 = arith.andi %23, %17 : vector<1x128xi1>
    %25 = vector.broadcast %13 : i32 to vector<1x128xi32>
    %26 = arith.addi %15, %25 : vector<1x128xi32>
    %27 = arith.select %24, %26, %15 : vector<1x128xi1>, vector<1x128xi32>
    %c1_i32_11 = arith.constant 1 : i32
    %28 = vector.broadcast %c1_i32_11 : i32 to vector<1x128xi32>
    %29 = arith.cmpi sge, %27, %28 : vector<1x128xi32>
    %c14_i32 = arith.constant 14 : i32
    %30 = vector.broadcast %c14_i32 : i32 to vector<1x128xi32>
    %31 = arith.cmpi sle, %27, %30 : vector<1x128xi32>
    %32 = arith.truncf %1 : vector<16x128xf32> to vector<16x128xbf16>
    %cst = arith.constant dense<0.000000e+00> : vector<48x128xf32>
    %33 = tpu.matmul %2, %32, %cst {dimension_numbers = #tpu.dot_dimension_numbers<[1], [0], [0], [1], [0, 0, 1, 1], [], []>} : vector<48x16xbf16>, vector<16x128xbf16>, vector<48x128xf32> -> vector<48x128xf32>
    %34 = vector.extract_strided_slice %33 {offsets = [16, 0], sizes = [16, 128], strides = [1, 1]} : vector<48x128xf32> to vector<16x128xf32>
    %35 = vector.broadcast %5 : vector<16x1xf32> to vector<16x128xf32>
    %36 = arith.addf %34, %35 : vector<16x128xf32>
    %37 = vector.extract_strided_slice %33 {offsets = [0, 0], sizes = [16, 128], strides = [1, 1]} : vector<48x128xf32> to vector<16x128xf32>
    %c1_i32_12 = arith.constant 1 : i32
    %38 = tpu.dynamic_rotate %37 by %c1_i32_12 dim 1 : vector<16x128xf32>, i32 -> vector<16x128xf32>
    %cst_13 = arith.constant 0.000000e+00 : f32
    %39 = vector.shape_cast %29 : vector<1x128xi1> to vector<1x128xi1>
    %40 = vector.broadcast %39 : vector<1x128xi1> to vector<16x128xi1>
    %41 = vector.broadcast %cst_13 : f32 to vector<16x128xf32>
    %42 = arith.select %40, %38, %41 : vector<16x128xi1>, vector<16x128xf32>
    %43 = arith.addf %36, %42 : vector<16x128xf32>
    %44 = vector.extract_strided_slice %33 {offsets = [32, 0], sizes = [16, 128], strides = [1, 1]} : vector<48x128xf32> to vector<16x128xf32>
    %c127_i32 = arith.constant 127 : i32
    %45 = tpu.dynamic_rotate %44 by %c127_i32 dim 1 : vector<16x128xf32>, i32 -> vector<16x128xf32>
    %cst_14 = arith.constant 0.000000e+00 : f32
    %46 = vector.shape_cast %31 : vector<1x128xi1> to vector<1x128xi1>
    %47 = vector.broadcast %46 : vector<1x128xi1> to vector<16x128xi1>
    %48 = vector.broadcast %cst_14 : f32 to vector<16x128xf32>
    %49 = arith.select %47, %45, %48 : vector<16x128xi1>, vector<16x128xf32>
    %50 = arith.addf %43, %49 : vector<16x128xf32>
    %51 = vector.shape_cast %50 : vector<16x128xf32> to vector<2x8x8x16xf32>
    %cst_15 = arith.constant dense<0.000000e+00> : vector<2x8xf32>
    %52 = vector.multi_reduction <add>, %51, %cst_15 [1, 3] : vector<2x8x8x16xf32> to vector<2x8xf32>
    %53 = vector.shape_cast %52 : vector<2x8xf32> to vector<2x1x8x1xf32>
    %54 = arith.mulf %51, %51 : vector<2x8x8x16xf32>
    %cst_16 = arith.constant dense<0.000000e+00> : vector<2x8xf32>
    %55 = vector.multi_reduction <add>, %54, %cst_16 [1, 3] : vector<2x8x8x16xf32> to vector<2x8xf32>
    %56 = vector.shape_cast %55 : vector<2x8xf32> to vector<2x1x8x1xf32>
    %cst_17 = arith.constant 1.280000e+02 : f32
    %57 = vector.broadcast %cst_17 : f32 to vector<2x1x8x1xf32>
    %58 = arith.divf %53, %57 : vector<2x1x8x1xf32>
    %cst_18 = arith.constant 1.280000e+02 : f32
    %59 = vector.broadcast %cst_18 : f32 to vector<2x1x8x1xf32>
    %60 = arith.divf %56, %59 : vector<2x1x8x1xf32>
    %61 = arith.mulf %58, %58 : vector<2x1x8x1xf32>
    %62 = arith.subf %60, %61 : vector<2x1x8x1xf32>
    %cst_19 = arith.constant 0.000000e+00 : f32
    %63 = vector.broadcast %cst_19 : f32 to vector<2x1x8x1xf32>
    %64 = arith.maximumf %62, %63 : vector<2x1x8x1xf32>
    %65 = vector.broadcast %58 : vector<2x1x8x1xf32> to vector<2x8x8x16xf32>
    %66 = arith.subf %51, %65 : vector<2x8x8x16xf32>
    %cst_20 = arith.constant 9.99999974E-6 : f32
    %67 = vector.broadcast %cst_20 : f32 to vector<2x1x8x1xf32>
    %68 = arith.addf %64, %67 : vector<2x1x8x1xf32>
    %69 = math.rsqrt %68 : vector<2x1x8x1xf32>
    %70 = vector.broadcast %69 : vector<2x1x8x1xf32> to vector<2x8x8x16xf32>
    %71 = arith.mulf %66, %70 : vector<2x8x8x16xf32>
    %72 = vector.shape_cast %71 : vector<2x8x8x16xf32> to vector<16x128xf32>
    %73 = vector.broadcast %6 : vector<16x1xf32> to vector<16x128xf32>
    %74 = arith.mulf %72, %73 : vector<16x128xf32>
    %75 = vector.broadcast %7 : vector<16x1xf32> to vector<16x128xf32>
    %76 = arith.addf %74, %75 : vector<16x128xf32>
    %cst_21 = arith.constant 0.000000e+00 : f32
    %77 = vector.broadcast %cst_21 : f32 to vector<16x128xf32>
    %78 = arith.maximumf %76, %77 : vector<16x128xf32>
    %79 = arith.truncf %78 : vector<16x128xf32> to vector<16x128xbf16>
    %cst_22 = arith.constant dense<0.000000e+00> : vector<48x128xf32>
    %80 = tpu.matmul %3, %79, %cst_22 {dimension_numbers = #tpu.dot_dimension_numbers<[1], [0], [0], [1], [0, 0, 1, 1], [], []>} : vector<48x16xbf16>, vector<16x128xbf16>, vector<48x128xf32> -> vector<48x128xf32>
    %81 = vector.extract_strided_slice %80 {offsets = [16, 0], sizes = [16, 128], strides = [1, 1]} : vector<48x128xf32> to vector<16x128xf32>
    %82 = vector.broadcast %8 : vector<16x1xf32> to vector<16x128xf32>
    %83 = arith.addf %81, %82 : vector<16x128xf32>
    %84 = vector.extract_strided_slice %80 {offsets = [0, 0], sizes = [16, 128], strides = [1, 1]} : vector<48x128xf32> to vector<16x128xf32>
    %c1_i32_23 = arith.constant 1 : i32
    %85 = tpu.dynamic_rotate %84 by %c1_i32_23 dim 1 : vector<16x128xf32>, i32 -> vector<16x128xf32>
    %cst_24 = arith.constant 0.000000e+00 : f32
    %86 = vector.shape_cast %29 : vector<1x128xi1> to vector<1x128xi1>
    %87 = vector.broadcast %86 : vector<1x128xi1> to vector<16x128xi1>
    %88 = vector.broadcast %cst_24 : f32 to vector<16x128xf32>
    %89 = arith.select %87, %85, %88 : vector<16x128xi1>, vector<16x128xf32>
    %90 = arith.addf %83, %89 : vector<16x128xf32>
    %91 = vector.extract_strided_slice %80 {offsets = [32, 0], sizes = [16, 128], strides = [1, 1]} : vector<48x128xf32> to vector<16x128xf32>
    %c127_i32_25 = arith.constant 127 : i32
    %92 = tpu.dynamic_rotate %91 by %c127_i32_25 dim 1 : vector<16x128xf32>, i32 -> vector<16x128xf32>
    %cst_26 = arith.constant 0.000000e+00 : f32
    %93 = vector.shape_cast %31 : vector<1x128xi1> to vector<1x128xi1>
    %94 = vector.broadcast %93 : vector<1x128xi1> to vector<16x128xi1>
    %95 = vector.broadcast %cst_26 : f32 to vector<16x128xf32>
    %96 = arith.select %94, %92, %95 : vector<16x128xi1>, vector<16x128xf32>
    %97 = arith.addf %90, %96 : vector<16x128xf32>
    %98 = vector.shape_cast %97 : vector<16x128xf32> to vector<2x8x8x16xf32>
    %cst_27 = arith.constant dense<0.000000e+00> : vector<2x8xf32>
    %99 = vector.multi_reduction <add>, %98, %cst_27 [1, 3] : vector<2x8x8x16xf32> to vector<2x8xf32>
    %100 = vector.shape_cast %99 : vector<2x8xf32> to vector<2x1x8x1xf32>
    %101 = arith.mulf %98, %98 : vector<2x8x8x16xf32>
    %cst_28 = arith.constant dense<0.000000e+00> : vector<2x8xf32>
    %102 = vector.multi_reduction <add>, %101, %cst_28 [1, 3] : vector<2x8x8x16xf32> to vector<2x8xf32>
    %103 = vector.shape_cast %102 : vector<2x8xf32> to vector<2x1x8x1xf32>
    %cst_29 = arith.constant 1.280000e+02 : f32
    %104 = vector.broadcast %cst_29 : f32 to vector<2x1x8x1xf32>
    %105 = arith.divf %100, %104 : vector<2x1x8x1xf32>
    %cst_30 = arith.constant 1.280000e+02 : f32
    %106 = vector.broadcast %cst_30 : f32 to vector<2x1x8x1xf32>
    %107 = arith.divf %103, %106 : vector<2x1x8x1xf32>
    %108 = arith.mulf %105, %105 : vector<2x1x8x1xf32>
    %109 = arith.subf %107, %108 : vector<2x1x8x1xf32>
    %cst_31 = arith.constant 0.000000e+00 : f32
    %110 = vector.broadcast %cst_31 : f32 to vector<2x1x8x1xf32>
    %111 = arith.maximumf %109, %110 : vector<2x1x8x1xf32>
    %112 = vector.broadcast %105 : vector<2x1x8x1xf32> to vector<2x8x8x16xf32>
    %113 = arith.subf %98, %112 : vector<2x8x8x16xf32>
    %cst_32 = arith.constant 9.99999974E-6 : f32
    %114 = vector.broadcast %cst_32 : f32 to vector<2x1x8x1xf32>
    %115 = arith.addf %111, %114 : vector<2x1x8x1xf32>
    %116 = math.rsqrt %115 : vector<2x1x8x1xf32>
    %117 = vector.broadcast %116 : vector<2x1x8x1xf32> to vector<2x8x8x16xf32>
    %118 = arith.mulf %113, %117 : vector<2x8x8x16xf32>
    %119 = vector.shape_cast %118 : vector<2x8x8x16xf32> to vector<16x128xf32>
    %120 = vector.broadcast %9 : vector<16x1xf32> to vector<16x128xf32>
    %121 = arith.mulf %119, %120 : vector<16x128xf32>
    %122 = vector.broadcast %10 : vector<16x1xf32> to vector<16x128xf32>
    %123 = arith.addf %121, %122 : vector<16x128xf32>
    %124 = arith.addf %123, %1 : vector<16x128xf32>
    %cst_33 = arith.constant 0.000000e+00 : f32
    %125 = vector.broadcast %cst_33 : f32 to vector<16x128xf32>
    %126 = arith.maximumf %124, %125 : vector<16x128xf32>
    %c0_34 = arith.constant 0 : index
    %c0_35 = arith.constant 0 : index
    %c0_36 = arith.constant 0 : index
    %127 = vector.load %arg5[%c0_34, %c0_35, %c0_36] : memref<1x16x128xf32, #tpu.memory_space<vmem>>, vector<1x16x128xf32>
    %128 = vector.shape_cast %127 : vector<1x16x128xf32> to vector<16x128xf32>
    %129 = vector.shape_cast %126 : vector<16x128xf32> to vector<1x16x128xf32>
    tpu.vector_store %arg5[%c0_34, %c0_35, %c0_36], %129 {strides = array<i32>} : memref<1x16x128xf32, #tpu.memory_space<vmem>>, vector<1x16x128xf32>,
    return
  }
  func.func @transform_0(%arg0: i32) -> (i32, i32, i32) {
    %c0_i32 = arith.constant 0 : i32
    %c0_i32_0 = arith.constant 0 : i32
    %c0_i32_1 = arith.constant 0 : i32
    return %arg0, %c0_i32, %c0_i32_0 : i32, i32, i32
  }
  func.func @transform_1(%arg0: i32) -> (i32, i32) {
    %c0_i32 = arith.constant 0 : i32
    %c0_i32_0 = arith.constant 0 : i32
    %c0_i32_1 = arith.constant 0 : i32
    return %c0_i32, %c0_i32_0 : i32, i32
  }
  func.func @transform_2(%arg0: i32) -> (i32, i32) {
    %c0_i32 = arith.constant 0 : i32
    %c0_i32_0 = arith.constant 0 : i32
    %c0_i32_1 = arith.constant 0 : i32
    return %c0_i32, %c0_i32_0 : i32, i32
  }
  func.func @transform_3(%arg0: i32) -> (i32, i32) {
    %c0_i32 = arith.constant 0 : i32
    %c0_i32_0 = arith.constant 0 : i32
    %c0_i32_1 = arith.constant 0 : i32
    return %c0_i32, %c0_i32_0 : i32, i32
  }
  func.func @transform_4(%arg0: i32) -> (i32, i32, i32) {
    %c0_i32 = arith.constant 0 : i32
    %c0_i32_0 = arith.constant 0 : i32
    %c0_i32_1 = arith.constant 0 : i32
    return %arg0, %c0_i32, %c0_i32_0 : i32, i32, i32
  }
}

</mosaic_0001>

<bundles_post_ra>
// kernel: tpu_custom_call.1
= control target key start
LH: loop header
LB: loop body
LE: loop exit
PB: predicated region body
PF: predicated region fallthrough
CT: control target
= control target key end

     0   :  { %9 = vsyncpa [#allocation3], 0  ;;  %s3562_s0 = inlined_call_operand.hbm [shape: f32[2,16,128], index: 0, kind: input, shape index: {}]   ;;  %s3563_s1 = inlined_call_operand.hbm [shape: bf16[48,16], index: 1, kind: input, shape index: {}]   ;;  %s3564_s2 = inlined_call_operand.hbm [shape: bf16[48,16], index: 2, kind: input, shape index: {}]   ;;  %s3565_s3 = inlined_call_operand.hbm [shape: f32[16,6], index: 3, kind: input, shape index: {}]   ;;  %s3566_s4 = inlined_call_operand.hbm [shape: f32[2,16,128], index: 4, kind: output, shape index: {}]  }
   0x1   :  { %11 = vsyncpa [#allocation3 + $0x1], 0 }
   0x2   :  { %12 = vsyncpa [#allocation6], 0 }
   0x3   :  { %13 = vsyncpa [#allocation9], 0 }
   0x4   :  { %14 = vsyncpa [#allocation4], 0 }
   0x5   :  { %16 = vsyncpa [#allocation4 + $0x1], 0  ;;  %s2707_s15 = smov 0   ;;  %s2709_s16 = smov 0  }
   0x6   :  { %s2711_s17 = smov 0   ;;  %s2713_s18 = smov 0  }
   0x7 LB: > { %s2728_s19 = sadd.s32 4294967295, %s2650_s18   ;;  %s2263_s20 = sadd.s32 4294967294, %s2650_s18   ;;  %s2650_s18 = sphi %s2713_s18, %s3593_s18   ;;  %s2646_s17 = sphi %s2711_s17, %s3592_s17   ;;  %s2642_s16 = sphi %s2709_s16, %s3591_s16   ;;  %s2638_s15 = sphi %s2707_s15, %s3590_s15  }
   0x8   : > { %p42_p0 = scmp.ne.s32.totalorder %s2642_s16, %s2638_s15  ;;  %p3567_p1 = scmp.eq.s32.totalorder %s2728_s19, 0 }
   0x9   : > { %p135_p3 = scmp.eq.s32.totalorder %s2263_s20, 1  ;;  %p2264_p5 = scmp.ge.s32.totalorder %s2650_s18, 1 }
   0xa   : > { %p2737_p4 = por %p3567_p1, %p42_p0  ;;  %p142_p7 = scmp.lt.s32.totalorder %s2650_s18, 3 }
   0xb   : > { %p2742_p6 = por %p135_p3, %p42_p0  ;;  %s2652_s24 = smov [#allocation5]  }
   0xc   : > { %s3570_s21 = scalar_select %p2737_p4, 1, 0 }
   0xd   : > { %s3571_s22 = scalar_select %p2742_p6, 1, 0 }
   0xe   : > { %p2747_p8 = pnand %p2264_p5, %p142_p7  ;;  %s154_s25 = sshll.u32 %s2652_s24, 4  ;;  %s2751_s25 = int_to_ptr.vmem [resolvable:$true] %s154_s25 }
   0xf   : > { %s2653_s27 = smov [#allocation7]   ;;  %s2654_s29 = smov [#allocation8]  }
  0x10   : > { %s3572_s23 = scalar_select %p2747_p8, 1, 0 }
  0x11   : > { %p2349_p9 = pneg %p2747_p8  ;;  %s167_s28 = sshll.u32 %s2653_s27, 4  ;;  %s2762_s28 = int_to_ptr.vmem [resolvable:$true] %s167_s28 }
  0x12   : > { %s2764_s30 = sshll.u32 %s2654_s29, 4  ;;  %s2462_s7 = scalar_lea.hbm %s3563_s1, 384  ;;  %s181_s30 = int_to_ptr.vmem [resolvable:$true] %s2764_s30 }
  0x13   : > { %p2758_p11 = pnand %p2349_p9, %p3567_p1  ;;  %p2463_p12 = scmp.ne.s32.totalorder %s3563_s1, %s2462_s7 }
  0x14   : > { %p2469_p5 = scmp.lt.u32.totalorder %s2462_s7, %s3563_s1 }
  0x15   : > { %p2774_p13 = pneg %p2758_p11 }
  0x17   : > { %p2465_p0 = pnand %p2774_p13, %p2463_p12 }
  0x19   : > { %p2466_p3 = pneg %p2465_p0 }
  0x1b   : > { %p2471_p7 = pnand %p2469_p5, %p2466_p3 }
  0x1d   : > { %2474 = shalt.err (!%p2471_p7)
}
  0x1e   : > { %s2475_s13 = scalar_lea.vmem %s2751_s25, 384  ;;  %p2483_p2 = scmp.lt.s32.totalorder %s2751_s25, %s2751_s25 }
  0x1f   : > { %p2476_p9 = scmp.ne.s32.totalorder %s2751_s25, %s2475_s13  ;;  %p2484_p6 = scmp.lt.s32.totalorder %s2475_s13, %s2475_s13 }
  0x21   : > { %p2478_p10 = pnand %p2476_p9, %p2774_p13  ;;  %p2485_p12 = por %p2484_p6, %p2483_p2 }
  0x23   : > { %p2479_p1 = pneg %p2478_p10 }
  0x25   : > { %p2486_p0 = pnand %p2485_p12, %p2479_p1 }
  0x27   : > { %2489 = shalt.err (!%p2486_p0)
}
  0x28   : > { %s2655_s14 = smov 64   ;;  %s2656_s20 = smov 4  }
  0x29   : > { %2352 = dma.hbm_to_vmem [thread:$0]  (!%p2758_p11), %s3563_s1, 384, %s2751_s25, [#allocation6], %s2655_s14, %s2655_s14, %s2656_s20  }
  0x2a   : > { %s2490_s6 = scalar_lea.hbm %s3564_s2, 384 }
  0x2b   : > { %p2491_p2 = scmp.ne.s32.totalorder %s3564_s2, %s2490_s6  ;;  %p2497_p10 = scmp.lt.u32.totalorder %s2490_s6, %s3564_s2 }
  0x2d   : > { %p2493_p1 = pnand %p2491_p2, %p2774_p13 }
  0x2f   : > { %p2494_p6 = pneg %p2493_p1 }
  0x31   : > { %p2499_p3 = pnand %p2497_p10, %p2494_p6 }
  0x33   : > { %2502 = shalt.err (!%p2499_p3)
}
  0x34   : > { %s2503_s25 = scalar_lea.vmem %s2762_s28, 384  ;;  %p2511_p12 = scmp.lt.s32.totalorder %s2762_s28, %s2762_s28 }
  0x35   : > { %p2504_p5 = scmp.ne.s32.totalorder %s2762_s28, %s2503_s25  ;;  %p2512_p0 = scmp.lt.s32.totalorder %s2503_s25, %s2503_s25 }
  0x37   : > { %p2506_p7 = pnand %p2504_p5, %p2774_p13  ;;  %p2513_p2 = por %p2512_p0, %p2511_p12 }
  0x39   : > { %p2507_p9 = pneg %p2506_p7 }
  0x3b   : > { %p2514_p1 = pnand %p2513_p2, %p2507_p9 }
  0x3d   : > { %2517 = shalt.err (!%p2514_p1)
}
  0x3e   : > { %2355 = dma.hbm_to_vmem [thread:$0]  (!%p2758_p11), %s3564_s2, 384, %s2762_s28, [#allocation6], %s2655_s14, %s2655_s14, %s2656_s20  }
  0x3f   : > { %s2518_s29 = scalar_lea.hbm %s3565_s3, 256 }
  0x40   : > { %p2519_p6 = scmp.ne.s32.totalorder %s3565_s3, %s2518_s29  ;;  %p2525_p5 = scmp.lt.u32.totalorder %s2518_s29, %s3565_s3 }
  0x42   : > { %p2521_p10 = pnand %p2519_p6, %p2774_p13 }
  0x44   : > { %p2522_p3 = pneg %p2521_p10 }
  0x46   : > { %p2527_p7 = pnand %p2525_p5, %p2522_p3 }
  0x48   : > { %2530 = shalt.err (!%p2527_p7)
}
  0x49   : > { %s2531_s9 = scalar_lea.vmem %s181_s30, 256  ;;  %p2539_p2 = scmp.lt.s32.totalorder %s181_s30, %s181_s30 }
  0x4a   : > { %p2532_p9 = scmp.ne.s32.totalorder %s181_s30, %s2531_s9  ;;  %p2540_p1 = scmp.lt.s32.totalorder %s2531_s9, %s2531_s9 }
  0x4c   : > { %p2534_p12 = pnand %p2532_p9, %p2774_p13  ;;  %p2541_p4 = por %p2540_p1, %p2539_p2 }
  0x4e   : > { %p2535_p0 = pneg %p2534_p12 }
  0x50   : > { %p2542_p8 = pnand %p2541_p4, %p2535_p0 }
  0x52   : > { %2545 = shalt.err (!%p2542_p8)
}
  0x53   : > { %s2657_s28 = smov 128   ;;  %s2658_s10 = smov 8  }
  0x54   : > { %2358 = dma.hbm_to_vmem [thread:$0]  (!%p2758_p11), %s3565_s3, 256, %s181_s30, [#allocation9], %s2657_s28, %s2657_s28, %s2658_s10  }
  0x55   : > { %s2841_s11 = sadd.s32 1, %s2650_s18   ;;  %s29_s12 = sadd.s32 1, %s2646_s17 }
  0x56   : > { %s26_s25 = ssub.s32 %s2650_s18, %s2841_s11  ;;  %p36_p8 = scmp.ne.s32.totalorder %s2646_s17, %s2642_s16 }
  0x57   : > { %p27_p4 = scmp.eq.s32.totalorder %s26_s25, 0  ;;  %p37_p13 = scmp.eq.s32.totalorder %s2650_s18, 0 }
  0x58   : > { %p2370_p6 = scmp.lt.s32.totalorder %s2650_s18, 2  ;;  %p3575_p3 = scmp.eq.s32.totalorder %s2728_s19, 1 }
  0x59   : > { %s2851_s13 = scalar_select %p27_p4, %s2646_s17, %s29_s12  }
  0x5a   : > { %p38_p10 = por %p37_p13, %p36_p8  ;;  %p2855_p5 = por %p3575_p3, %p36_p8 }
  0x5b   : > { %s194_s24 = sand.u32 1, %s2646_s17   ;;  %s2295_s27 = sshll.u32 %s2650_s18, 8 }
  0x5c   : > { %s2269_s30 = sshll.u32 %s194_s24, 4  ;;  %s2864_s6 = scalar_lea.hbm %s3562_s0, %s2295_s27 }
  0x5d   : > { %s198_s7 = scalar_lea.vmem [#allocation2], %s2269_s30  ;;  %p2866_p11 = pnand %p2370_p6, %p38_p10 }
  0x5e   : > { %s205_s8 = sshll.u32 %s198_s7, 4  ;;  %s2872_s14 = scalar_lea.sflag [#allocation3], %s194_s24  ;;  %s2870_s8 = int_to_ptr.vmem [resolvable:$true] %s205_s8 }
  0x5f   : > { %s2546_s20 = scalar_lea.hbm %s2864_s6, 256  ;;  %p2548_p9 = pneg %p2866_p11 }
  0x60   : > { %p2547_p7 = scmp.ne.s32.totalorder %s2864_s6, %s2546_s20  ;;  %s2551_s27 = scalar_lea.hbm %s3562_s0, 512 }
  0x61   : > { %p2552_p2 = scmp.lt.u32.totalorder %s2864_s6, %s3562_s0  ;;  %p2553_p1 = scmp.lt.u32.totalorder %s2551_s27, %s2546_s20 }
  0x62   : > { %p2549_p12 = pnand %p2548_p9, %p2547_p7  ;;  %p2555_p8 = scmp.lt.u32.totalorder %s2546_s20, %s2864_s6 }
  0x63   : > { %p2554_p4 = por %p2553_p1, %p2552_p2 }
  0x64   : > { %p2550_p0 = pneg %p2549_p12 }
  0x65   : > { %p2556_p13 = por %p2555_p8, %p2554_p4 }
  0x67   : > { %p2557_p6 = pnand %p2556_p13, %p2550_p0 }
  0x69   : > { %2560 = shalt.err (!%p2557_p6)
}
  0x6a   : > { %s2561_s24 = scalar_lea.vmem %s2870_s8, 256  ;;  %s2659_s5 = smov [#allocation2]  }
  0x6b   : > { %p2562_p10 = scmp.ne.s32.totalorder %s2870_s8, %s2561_s24  ;;  %s2566_s7 = sshll.u32 %s2659_s5, 4  ;;  %s2567_s7 = int_to_ptr.vmem [resolvable:$false] %s2566_s7 }
  0x6c   : > { %s2568_s25 = scalar_lea.vmem %s2567_s7, 512  ;;  %p2569_p12 = scmp.lt.s32.totalorder %s2870_s8, %s2567_s7 }
  0x6d   : > { %p2564_p3 = pnand %p2562_p10, %p2548_p9  ;;  %p2570_p2 = scmp.lt.s32.totalorder %s2568_s25, %s2561_s24 }
  0x6f   : > { %p2565_p7 = pneg %p2564_p3  ;;  %p2571_p1 = por %p2570_p2, %p2569_p12 }
  0x71   : > { %p2572_p4 = pnand %p2571_p1, %p2565_p7 }
  0x73   : > { %2575 = shalt.err (!%p2572_p4)
}
  0x74   : > { %2362 = dma.hbm_to_vmem [thread:$0]  (!%p2866_p11), %s2864_s6, 256, %s2870_s8, %s2872_s14, %s2657_s28, %s2657_s28, %s2658_s10  }
  0x75   : > { %p3578_p9 = scmp.ne.s32.totalorder %s3572_s23, 0 }
  0x76   : > { %s2906_s20 = sand.u32 (!%p3578_p9), 1, %s2642_s16   ;;  %p3579_p0 = scmp.ne.s32.totalorder (!%p3578_p9), %s3570_s21, 0 }
  0x77   : > { %217 = sbr.rel (%p3578_p9) target bundleno = 1845 (0x735), region = 36  ;;  %s2273_s12 = sshll.u32 (!%p3578_p9), %s2906_s20, 4 }
  0x78   : > { %s220_s27 = scalar_lea.sflag (!%p3578_p9), [#allocation3], %s2906_s20  ;;  %s2912_s9 = scalar_lea.vmem (!%p3578_p9), [#allocation2], %s2273_s12 }
  0x7e   : > { %2621 = dma.done.wait (%p3579_p0), %s220_s27, 256  }
  0x7f   : > { %2623 = vsyncadd (%p3579_p0), %s220_s27, 4294967040  ;;  %p3580_p11 = scmp.eq.s32.totalorder %s2728_s19, 0 }
  0x81   : > { %2625 = dma.done.wait (%p3580_p11), [#allocation6], 768   ;;  %p3581_p8 = pmov %p3580_p11 }
  0x83   : > { %2627 = vsyncadd (%p3581_p8), [#allocation6], 4294966528  ;;  %p3582_p13 = pmov %p3581_p8 }
  0x84   : > { %p3583_p6 = pmov %p3581_p8 }
  0x85   : > { %2629 = dma.done.wait (%p3582_p13), [#allocation9], 256  }
  0x86   : > { %2631 = vsyncadd (%p3583_p6), [#allocation9], 4294967040  ;;  %v2660_v0 = vmov 0.0   ;;  %vm2661_vm0 = vmmov 0   ;;  %v2662_v1 = vmov 0   ;;  %v261_v2 = vld [vmem:[%s2912_s9] sm:$0xff]  ;;  %v277_v22 = vlaneseq }
  0x87   : > { %2305 = vmatprep.subr.bf16.mxu0 %v2660_v0  ;;  %2307 = vmatprep.mubr.msk.bf16.mxu0 %vm2661_vm0, %v2660_v0  ;;  %v262_v3 = vld [vmem:[%s2912_s9 + $0x8] sm:$0xff]  ;;  %v2444_v5 = vld [vmem:[#allocation5] sm:$0xff]   ;;  %vm309_vm1 = vcmask 130048   ;;  %v2934_v6 = vld [vmem:[#allocation8] sm:$0xff]  ;;  %s2663_s21 = smov 1   ;;  %s2664_s23 = smov 127  }
  0x88   : > { %2435 = vset.pattern.permute.xlu0 %v2662_v1  ;;  %2319 = vmatprep.subr.bf16.mxu1 %v2660_v0  ;;  %v293_v4 = vpack.c.bf16 %v262_v3, %v261_v2  ;;  %v2937_v7 = vld [vmem:[#allocation8 + $0x8] sm:$0xff]  ;;  %v2445_v8 = vld [vmem:[#allocation5 + $0x8] sm:$0xff]   ;;  %v2446_v9 = vld [vmem:[#allocation5 + $0x10] sm:$0xff]   ;;  %v278_v23 = vand.u32 127, %v277_v22  ;;  %s2665_s28 = smov 112   ;;  %s2666_s10 = smov 96  }
  0x89   : > { %2321 = vmatprep.mubr.msk.bf16.mxu1 %vm2661_vm0, %v2660_v0  ;;  %378 = vperm.xlu0 %2435, %v2934_v6   ;;  %s2667_s6 = smov 80   ;;  %s2668_s8 = smov 64   ;;  %v2672_v48 = vmov 1983009808   ;;  %v458_v53 = vshrl.u32 %v277_v22, 7  ;;  %vm1185_vm4 = vcmask 261120  }
  0x8a   : > { %2306 = vmatpush3.bf16.msra.mxu0 %v293_v4  ;;  %v283_v25 = vand.u32 15, %v278_v23  ;;  %s2669_s14 = smov 48   ;;  %s2670_s30 = smov 32   ;;  %v455_v49 = vunpack.c.l.s4 %v2672_v48  ;;  %v2673_v55 = vmov 1934713408   ;;  %vm1188_vm5 = vcmask 392192  }
  0x8b   : > { %s2671_s29 = smov 16   ;;  %v519_v56 = vunpack.c.l.s4 %v2673_v55  ;;  %vm1191_vm6 = vcmask 523264   ;;  %vm1194_vm7 = vcmask 654336   ;;  %vm1197_vm8 = vcmask 785408   ;;  %s2296_s24 = sshll.u32 %s2728_s19, 8 }
  0x8c   : > { %vm2951_vm2 = vcmp.ge.s32.totalorder %v283_v25, 1  ;;  %vm2957_vm3 = vcmp.le.s32.totalorder %v283_v25, 14  ;;  %v456_v52 = vunpack.c.0.s8 %v455_v49  ;;  %vm1200_vm9 = vcmask 916480   ;;  %s259_s5 = scalar_lea.vmem [#allocation10], %s2273_s12  ;;  %s2148_s19 = scalar_lea.sflag [#allocation4], %s2906_s20 }
  0x8d   : > { %2308 = vmatmul.mubr.msk.bf16.vlgmr.msra.gmra.mrb[0].mxu0 %vm309_vm1, %v2444_v5  ;;  %383 = vperm.xlu0 %2435, %v2937_v7   ;;  %v520_v63 = vunpack.c.0.s8 %v519_v56  ;;  %s2161_s7 = sshll.u32 %s259_s5, 4  ;;  %s2679_s12 = smov [#allocation10]   ;;  %s3518_s7 = int_to_ptr.vmem [resolvable:$true] %s2161_s7 }
  0x8e   : > { %2311 = vmatprep.mubr.msk.bf16.mxu0 %vm2661_vm0, %v2660_v0  ;;  %v2981_v60 = vsub.s32 %v456_v52, %v458_v53 }
  0x95   : > { %2312 = vmatmul.mubr.msk.bf16.gmra.mrb[4].mxu0 %vm309_vm1, %v2445_v8 }
  0x96   : > { %2315 = vmatprep.mubr.msk.bf16.mxu0 %vm2661_vm0, %v2660_v0 }
  0x9d   : > { %2316 = vmatmul.mubr.msk.bf16.gmra.mrb[8].mxu0 %vm309_vm1, %v2446_v9 }
 0x108   : > { %v379_v24 = vpop.permute.xlu0 %378 }
 0x10c   : > { %v384_v28 = vpop.permute.xlu0 %383 }
 0x160   : > { %v353_v10 = vpop.f32.mrb[0].mxu0 }
 0x161   : > { %388 = vrot.lane.b32.xlu1 %v353_v10, %s2663_s21  ;;  %v2309_v11 = vpop.f32.mrb[1].mxu0 }
 0x162   : > { %v356_v12 = vpop.f32.mrb[2].mxu0 }
 0x163   : > { %v2310_v13 = vpop.f32.mrb[3].mxu0 }
 0x165   : > { %390 = vrot.lane.b32.xlu1 %v356_v12, %s2663_s21 }
 0x168   : > { %v361_v14 = vpop.f32.mrb[4].mxu0 }
 0x169   : > { %v2313_v15 = vpop.f32.mrb[5].mxu0  ;;  %v386_v31 = vadd.f32 %v379_v24, %v361_v14  ;;  %v2986_v14 = vsub.s32 %v520_v63, %v458_v53 }
 0x16a   : > { %v364_v16 = vpop.f32.mrb[6].mxu0 }
 0x16b   : > { %v2314_v17 = vpop.f32.mrb[7].mxu0  ;;  %v387_v34 = vadd.f32 %v384_v28, %v364_v16 }
 0x170   : > { %v369_v18 = vpop.f32.mrb[8].mxu0 }
 0x171   : > { %398 = vrot.lane.b32.xlu0 %v369_v18, %s2664_s23  ;;  %v2317_v19 = vpop.f32.mrb[9].mxu0 }
 0x172   : > { %v372_v20 = vpop.f32.mrb[10].mxu0 }
 0x173   : > { %400 = vrot.lane.b32.xlu1 %v372_v20, %s2664_s23  ;;  %v2318_v21 = vpop.f32.mrb[11].mxu0 }
 0x1d3   : > { %v389_v26 = vpop.permute.xlu1 %388 }
 0x1d4   : > { %v394_v30 = vsel %vm2951_vm2, %v389_v26, 0.0 }
 0x1d5   : > { %v396_v35 = vadd.f32 %v394_v30, %v386_v31 }
 0x1d7   : > { %v391_v29 = vpop.permute.xlu1 %390 }
 0x1d8   : > { %v395_v33 = vsel %vm2951_vm2, %v391_v29, 0.0 }
 0x1d9   : > { %v397_v38 = vadd.f32 %v395_v33, %v387_v34 }
 0x1e3   : > { %v399_v36 = vpop.permute.xlu0 %398 }
 0x1e4   : > { %v404_v37 = vsel %vm2957_vm3, %v399_v36, 0.0 }
 0x1e5   : > { %v406_v39 = vadd.f32 %v404_v37, %v396_v35  ;;  %v401_v40 = vpop.permute.xlu1 %400 }
 0x1e6   : > { %v405_v41 = vsel %vm2957_vm3, %v401_v40, 0.0 }
 0x1e7   : > { %v407_v42 = vadd.f32 %v405_v41, %v397_v38  ;;  %410 = vrot.lane.b32.xlu0 %v406_v39, %s2665_s28 }
 0x1e9   : > { %412 = vrot.lane.b32.xlu1 %v407_v42, %s2665_s28 }
 0x1eb   : > { %416 = vrot.lane.b32.xlu0 %v406_v39, %s2666_s10 }
 0x1ed   : > { %418 = vrot.lane.b32.xlu1 %v407_v42, %s2666_s10 }
 0x1ef   : > { %422 = vrot.lane.b32.xlu0 %v406_v39, %s2667_s6 }
 0x1f1   : > { %424 = vrot.lane.b32.xlu1 %v407_v42, %s2667_s6 }
 0x1f3   : > { %428 = vrot.lane.b32.xlu0 %v406_v39, %s2668_s8 }
 0x1f5   : > { %430 = vrot.lane.b32.xlu1 %v407_v42, %s2668_s8 }
 0x1f7   : > { %434 = vrot.lane.b32.xlu0 %v406_v39, %s2669_s14 }
 0x1f9   : > { %436 = vrot.lane.b32.xlu1 %v407_v42, %s2669_s14 }
 0x1fb   : > { %440 = vrot.lane.b32.xlu0 %v406_v39, %s2670_s30 }
 0x1fd   : > { %442 = vrot.lane.b32.xlu1 %v407_v42, %s2670_s30 }
 0x1ff   : > { %446 = vrot.lane.b32.xlu0 %v406_v39, %s2671_s29 }
 0x201   : > { %448 = vrot.lane.b32.xlu1 %v407_v42, %s2671_s29 }
 0x259   : > { %v411_v43 = vpop.permute.xlu0 %410 }
 0x25b   : > { %v413_v44 = vpop.permute.xlu1 %412 }
 0x25d   : > { %v417_v45 = vpop.permute.xlu0 %416 }
 0x25e   : > { %v452_v61 = vcombine.low %v406_v39, %v417_v45  ;;  %v453_v1 = vcombine.high %v406_v39, %v417_v45 }
 0x25f   : > { %v419_v46 = vpop.permute.xlu1 %418 }
 0x260   : > { %v588_v2 = vcombine.low %v407_v42, %v419_v46  ;;  %v589_v3 = vcombine.high %v407_v42, %v419_v46  ;;  %v460_v10 = vrot.slane %v452_v61, %v2981_v60  ;;  %v467_v15 = vrot.slane %v453_v1, %v2981_v60 }
 0x261   : > { %v423_v47 = vpop.permute.xlu0 %422 }
 0x262   : > { %v468_v57 = vcombine.low %v411_v43, %v423_v47  ;;  %v469_v59 = vcombine.high %v411_v43, %v423_v47  ;;  %v596_v16 = vrot.slane %v588_v2, %v2981_v60  ;;  %v603_v17 = vrot.slane %v589_v3, %v2981_v60 }
 0x263   : > { %v425_v50 = vpop.permute.xlu1 %424 }
 0x264   : > { %v476_v4 = vrot.slane %v468_v57, %v2981_v60  ;;  %v483_v8 = vrot.slane %v469_v59, %v2981_v60  ;;  %v604_v9 = vcombine.low %v413_v44, %v425_v50  ;;  %v605_v11 = vcombine.high %v413_v44, %v425_v50 }
 0x265   : > { %v429_v51 = vpop.permute.xlu0 %428 }
 0x266   : > { %v516_v18 = vcombine.low %v460_v10, %v476_v4  ;;  %v517_v19 = vcombine.high %v460_v10, %v476_v4  ;;  %v532_v22 = vcombine.low %v467_v15, %v483_v8  ;;  %v612_v23 = vrot.slane %v604_v9, %v2981_v60 }
 0x267   : > { %v431_v54 = vpop.permute.xlu1 %430  ;;  %v619_v26 = vrot.slane %v605_v11, %v2981_v60  ;;  %v533_v39 = vcombine.high %v467_v15, %v483_v8 }
 0x268   : > { %v524_v37 = vrot.slane %v516_v18, %v2986_v14  ;;  %v531_v38 = vrot.slane %v517_v19, %v2986_v14  ;;  %v652_v41 = vcombine.low %v596_v16, %v612_v23  ;;  %v653_v42 = vcombine.high %v596_v16, %v612_v23 }
 0x269   : > { %v435_v58 = vpop.permute.xlu0 %434  ;;  %v668_v49 = vcombine.low %v603_v17, %v619_v26  ;;  %v669_v50 = vcombine.high %v603_v17, %v619_v26  ;;  %v540_v57 = vrot.slane %v532_v22, %v2986_v14 }
 0x26a   : > { %v660_v63 = vrot.slane %v652_v41, %v2986_v14  ;;  %v667_v3 = vrot.slane %v653_v42, %v2986_v14 }
 0x26b   : > { %v437_v62 = vpop.permute.xlu1 %436  ;;  %v676_v4 = vrot.slane %v668_v49, %v2986_v14 }
 0x26d   : > { %v441_v5 = vpop.permute.xlu0 %440 }
 0x26e   : > { %v484_v12 = vcombine.low %v429_v51, %v441_v5  ;;  %v485_v20 = vcombine.high %v429_v51, %v441_v5  ;;  %v683_v5 = vrot.slane %v669_v50, %v2986_v14 }
 0x26f   : > { %v443_v13 = vpop.permute.xlu1 %442 }
 0x270   : > { %v492_v28 = vrot.slane %v484_v12, %v2981_v60  ;;  %v620_v29 = vcombine.low %v431_v54, %v443_v13  ;;  %v621_v30 = vcombine.high %v431_v54, %v443_v13  ;;  %v499_v40 = vrot.slane %v485_v20, %v2981_v60 }
 0x271   : > { %v447_v21 = vpop.permute.xlu0 %446 }
 0x272   : > { %v500_v24 = vcombine.low %v435_v58, %v447_v21  ;;  %v501_v25 = vcombine.high %v435_v58, %v447_v21  ;;  %v628_v45 = vrot.slane %v620_v29, %v2981_v60  ;;  %v635_v51 = vrot.slane %v621_v30, %v2981_v60 }
 0x273   : > { %v449_v31 = vpop.permute.xlu1 %448 }
 0x274   : > { %v508_v33 = vrot.slane %v500_v24, %v2981_v60  ;;  %v515_v34 = vrot.slane %v501_v25, %v2981_v60  ;;  %v636_v35 = vcombine.low %v437_v62, %v449_v31  ;;  %v637_v36 = vcombine.high %v437_v62, %v449_v31 }
 0x275   : > { %v547_v62 = vrot.slane %v533_v39, %v2986_v14 }
 0x276   : > { %v548_v43 = vcombine.low %v492_v28, %v508_v33  ;;  %v549_v44 = vcombine.high %v492_v28, %v508_v33  ;;  %v564_v46 = vcombine.low %v499_v40, %v515_v34  ;;  %v644_v47 = vrot.slane %v636_v35, %v2981_v60 }
 0x277   : > { %v651_v48 = vrot.slane %v637_v36, %v2981_v60  ;;  %v565_v54 = vcombine.high %v499_v40, %v515_v34 }
 0x278   : > { %v556_v52 = vrot.slane %v548_v43, %v2986_v14  ;;  %v563_v53 = vrot.slane %v549_v44, %v2986_v14  ;;  %v684_v55 = vcombine.low %v628_v45, %v644_v47  ;;  %v685_v56 = vcombine.high %v628_v45, %v644_v47 }
 0x279   : > { %v700_v61 = vcombine.low %v635_v51, %v651_v48  ;;  %v572_v1 = vrot.slane %v564_v46, %v2986_v14  ;;  %v579_v9 = vrot.slane %v565_v54, %v2986_v14  ;;  %v701_v11 = vcombine.high %v635_v51, %v651_v48 }
 0x27a   : > { %v3006_v58 = vcombine.low %v524_v37, %v556_v52  ;;  %v3008_v59 = vcombine.high %v524_v37, %v556_v52  ;;  %v692_v2 = vrot.slane %v684_v55, %v2986_v14  ;;  %v699_v8 = vrot.slane %v685_v56, %v2986_v14 }
 0x27b   : > { %v3019_v10 = vcombine.low %v531_v38, %v563_v53  ;;  %v708_v16 = vrot.slane %v700_v61, %v2986_v14  ;;  %v3030_v18 = vcombine.high %v531_v38, %v563_v53  ;;  %v3032_v19 = vcombine.low %v540_v57, %v572_v1 }
 0x27c   : > { %v3021_v12 = vcombine.low %v660_v63, %v692_v2  ;;  %v724_v13 = vsel %vm309_vm1, %v3006_v58, 0.0  ;;  %v725_v15 = vsel %vm309_vm1, %v3008_v59, 0.0  ;;  %v3028_v17 = vcombine.high %v660_v63, %v692_v2 }
 0x27d   : > { %v3034_v20 = vcombine.high %v540_v57, %v572_v1  ;;  %v758_v21 = vmul.f32 %v3006_v58, %v3006_v58  ;;  %v759_v22 = vmul.f32 %v3008_v59, %v3008_v59  ;;  %v3040_v23 = vcombine.low %v667_v3, %v699_v8 }
 0x27e   : > { %v741_v24 = vsel %vm309_vm1, %v3021_v12, 0.0  ;;  %v742_v25 = vsel %vm309_vm1, %v3028_v17, 0.0  ;;  %v760_v26 = vmul.f32 %v3019_v10, %v3019_v10  ;;  %v715_v28 = vrot.slane %v701_v11, %v2986_v14 }
 0x27f   : > { %v3049_v29 = vcombine.high %v667_v3, %v699_v8  ;;  %v726_v30 = vadd.f32 %v725_v15, %v724_v13  ;;  %v3051_v31 = vcombine.low %v676_v4, %v708_v16  ;;  %v3053_v33 = vcombine.high %v676_v4, %v708_v16 }
 0x280   : > { %v3055_v34 = vcombine.low %v547_v62, %v579_v9  ;;  %v727_v35 = vsel %vm309_vm1, %v3019_v10, 0.0  ;;  %v766_v36 = vmul.f32 %v3021_v12, %v3021_v12  ;;  %v767_v37 = vmul.f32 %v3028_v17, %v3028_v17 }
 0x281   : > { %v728_v38 = vadd.f32 %v727_v35, %v726_v30  ;;  %v743_v39 = vadd.f32 %v742_v25, %v741_v24  ;;  %v768_v40 = vmul.f32 %v3040_v23, %v3040_v23  ;;  %v3065_v41 = vcombine.high %v547_v62, %v579_v9 }
 0x282   : > { %v729_v42 = vsel %vm309_vm1, %v3030_v18, 0.0  ;;  %v744_v43 = vsel %vm309_vm1, %v3040_v23, 0.0  ;;  %v731_v45 = vsel %vm309_vm1, %v3032_v19, 0.0  ;;  %v733_v46 = vsel %vm309_vm1, %v3034_v20, 0.0 }
 0x283   : > { %v730_v44 = vadd.f32 %v729_v42, %v728_v38  ;;  %v745_v47 = vadd.f32 %v744_v43, %v743_v39  ;;  %v735_v48 = vsel %vm309_vm1, %v3055_v34, 0.0  ;;  %v3077_v49 = vcombine.low %v683_v5, %v715_v28 }
 0x284   : > { %v746_v50 = vsel %vm309_vm1, %v3049_v29, 0.0  ;;  %v761_v51 = vmul.f32 %v3030_v18, %v3030_v18  ;;  %v774_v54 = vsel %vm309_vm1, %v758_v21, 0.0  ;;  %v775_v55 = vsel %vm309_vm1, %v759_v22, 0.0 }
 0x285   : > { %v732_v52 = vadd.f32 %v731_v45, %v730_v44  ;;  %v747_v53 = vadd.f32 %v746_v50, %v745_v47  ;;  %v737_v56 = vsel %vm309_vm1, %v3065_v41, 0.0  ;;  %v3087_v57 = vcombine.high %v683_v5, %v715_v28 }
 0x286   : > { %v748_v61 = vsel %vm309_vm1, %v3051_v31, 0.0  ;;  %v776_v62 = vadd.f32 %v775_v55, %v774_v54  ;;  %v762_v2 = vmul.f32 %v3032_v19, %v3032_v19  ;;  %v777_v3 = vsel %vm309_vm1, %v760_v26, 0.0 }
 0x287   : > { %v734_v63 = vadd.f32 %v733_v46, %v732_v52  ;;  %v749_v1 = vadd.f32 %v748_v61, %v747_v53  ;;  %v750_v4 = vsel %vm309_vm1, %v3053_v33, 0.0  ;;  %v752_v8 = vsel %vm309_vm1, %v3077_v49, 0.0 }
 0x288   : > { %v763_v5 = vmul.f32 %v3034_v20, %v3034_v20  ;;  %v778_v9 = vadd.f32 %v777_v3, %v776_v62  ;;  %v764_v15 = vmul.f32 %v3055_v34, %v3055_v34  ;;  %v779_v16 = vsel %vm309_vm1, %v761_v51, 0.0 }
 0x289   : > { %v736_v11 = vadd.f32 %v735_v48, %v734_v63  ;;  %v751_v13 = vadd.f32 %v750_v4, %v749_v1  ;;  %v769_v22 = vmul.f32 %v3049_v29, %v3049_v29  ;;  %v791_v24 = vsel %vm309_vm1, %v766_v36, 0.0 }
 0x28a   : > { %v780_v21 = vadd.f32 %v779_v16, %v778_v9  ;;  %v792_v25 = vsel %vm309_vm1, %v767_v37, 0.0  ;;  %v781_v30 = vsel %vm309_vm1, %v762_v2, 0.0  ;;  %v754_v38 = vsel %vm309_vm1, %v3087_v57, 0.0 }
 0x28b   : > { %v738_v26 = vadd.f32 %v737_v56, %v736_v11  ;;  %v753_v28 = vadd.f32 %v752_v8, %v751_v13  ;;  %v793_v35 = vadd.f32 %v792_v25, %v791_v24  ;;  %v770_v42 = vmul.f32 %v3051_v31, %v3051_v31 }
 0x28c   : > { %v782_v39 = vadd.f32 %v781_v30, %v780_v21  ;;  %v794_v43 = vsel %vm309_vm1, %v768_v40, 0.0  ;;  %v765_v36 = vmul.f32 %v3065_v41, %v3065_v41  ;;  %v783_v37 = vsel %vm309_vm1, %v763_v5, 0.0 }
 0x28d   : > { %739 = vadd.xlane.f32.xlu0 %v738_v26  ;;  %v755_v44 = vadd.f32 %v754_v38, %v753_v28  ;;  %v795_v45 = vadd.f32 %v794_v43, %v793_v35  ;;  %v771_v47 = vmul.f32 %v3053_v33, %v3053_v33  ;;  %v796_v48 = vsel %vm309_vm1, %v769_v22, 0.0 }
 0x28e   : > { %v784_v46 = vadd.f32 %v783_v37, %v782_v39  ;;  %v785_v50 = vsel %vm309_vm1, %v764_v15, 0.0  ;;  %v772_v40 = vmul.f32 %v3077_v49, %v3077_v49  ;;  %v798_v53 = vsel %vm309_vm1, %v770_v42, 0.0 }
 0x28f   : > { %756 = vadd.xlane.f32.xlu1 %v755_v44  ;;  %v797_v51 = vadd.f32 %v796_v48, %v795_v45  ;;  %v787_v54 = vsel %vm309_vm1, %v765_v36, 0.0  ;;  %v773_v61 = vmul.f32 %v3087_v57, %v3087_v57  ;;  %v800_v62 = vsel %vm309_vm1, %v771_v47, 0.0 }
 0x290   : > { %v786_v52 = vadd.f32 %v785_v50, %v784_v46  ;;  %v802_v1 = vsel %vm309_vm1, %v772_v40, 0.0  ;;  %v2674_v8 = vmov 1   ;;  %v2675_v5 = vmov 2  }
 0x291   : > { %v799_v55 = vadd.f32 %v798_v53, %v797_v51  ;;  %v804_v3 = vsel %vm309_vm1, %v773_v61, 0.0  ;;  %2436 = vset.pattern.permute.xlu1 %v2674_v8  ;;  %2437 = vset.pattern.permute.xlu0 %v2675_v5 }
 0x292   : > { %v788_v56 = vadd.f32 %v787_v54, %v786_v52 }
 0x293   : > { %v801_v63 = vadd.f32 %v800_v62, %v799_v55 }
 0x294   : > { %789 = vadd.xlane.f32.xlu0 %v788_v56 }
 0x295   : > { %v803_v2 = vadd.f32 %v802_v1, %v801_v63 }
 0x297   : > { %v805_v4 = vadd.f32 %v804_v3, %v803_v2 }
 0x299   : > { %806 = vadd.xlane.f32.xlu0 %v805_v4 }
 0x2a0   : > { %1204 = vperm.xlu1 %2436, %v2934_v6  }
 0x2a4   : > { %1208 = vperm.xlu1 %2436, %v2937_v7  }
 0x2a8   : > { %2438 = vset.pattern.permute.xlu1 %v2675_v5 }
 0x2a9   : > { %1218 = vperm.xlu1 %2438, %v2937_v7  }
 0x2af   : > { %1214 = vperm.xlu0 %2437, %v2934_v6  }
 0x31a   : > { %v740_v9 = vpop.xlane.xlu0 %739 }
 0x31b   : > { %v809_v11 = vmul.f32 0.0078125, %v740_v9 }
 0x31c   : > { %v757_v13 = vpop.xlane.xlu1 %756 }
 0x31d   : > { %v813_v16 = vmul.f32 %v809_v11, %v809_v11  ;;  %v3133_v22 = vmul.f32 0.0078125, %v757_v13  ;;  %v819_v43 = vsub.f32 %v3006_v58, %v809_v11  ;;  %v820_v44 = vsub.f32 %v3008_v59, %v809_v11 }
 0x31e   : > { %v821_v36 = vsub.f32 %v3019_v10, %v809_v11  ;;  %v822_v37 = vsub.f32 %v3030_v18, %v809_v11  ;;  %v823_v45 = vsub.f32 %v3032_v19, %v809_v11  ;;  %v824_v46 = vsub.f32 %v3034_v20, %v809_v11 }
 0x31f   : > { %v814_v30 = vmul.f32 %v3133_v22, %v3133_v22  ;;  %v825_v47 = vsub.f32 %v3055_v34, %v809_v11  ;;  %v826_v48 = vsub.f32 %v3065_v41, %v809_v11  ;;  %v827_v50 = vsub.f32 %v3021_v12, %v3133_v22 }
 0x320   : > { %v828_v58 = vsub.f32 %v3028_v17, %v3133_v22  ;;  %v829_v59 = vsub.f32 %v3040_v23, %v3133_v22  ;;  %v830_v18 = vsub.f32 %v3049_v29, %v3133_v22  ;;  %v831_v19 = vsub.f32 %v3051_v31, %v3133_v22 }
 0x321   : > { %v790_v15 = vpop.xlane.xlu0 %789  ;;  %v832_v20 = vsub.f32 %v3053_v33, %v3133_v22  ;;  %v833_v34 = vsub.f32 %v3077_v49, %v3133_v22 }
 0x322   : > { %v811_v21 = vmul.f32 0.0078125, %v790_v15 }
 0x324   : > { %v815_v24 = vsub.f32 %v811_v21, %v813_v16  ;;  %v834_v16 = vsub.f32 %v3087_v57, %v3133_v22 }
 0x326   : > { %v817_v25 = vmax.f32 %v815_v24, 0.0  ;;  %v807_v26 = vpop.xlane.xlu0 %806 }
 0x327   : > { %v812_v28 = vmul.f32 0.0078125, %v807_v26 }
 0x328   : > { %v835_v35 = vadd.f32 1e-05, %v817_v25 }
 0x329   : > { %v816_v38 = vsub.f32 %v812_v28, %v814_v30 }
 0x32a   : > { %2450 = vrsqrt.f32 %v835_v35 }
 0x32b   : > { %v818_v39 = vmax.f32 %v816_v38, 0.0 }
 0x32d   : > { %v836_v42 = vadd.f32 1e-05, %v818_v39 }
 0x32f   : > { %2452 = vrsqrt.f32 %v836_v42 }
 0x334   : > { %v2451_v10 = vpop.eup %2450 }
 0x335   : > { %v839_v12 = vmul.f32 %v2451_v10, %v819_v43  ;;  %v840_v41 = vmul.f32 %v2451_v10, %v820_v44  ;;  %v841_v51 = vmul.f32 %v2451_v10, %v821_v36  ;;  %v842_v17 = vmul.f32 %v2451_v10, %v822_v37 }
 0x336   : > { %v843_v52 = vmul.f32 %v2451_v10, %v823_v45  ;;  %v844_v40 = vmul.f32 %v2451_v10, %v824_v46  ;;  %v845_v23 = vmul.f32 %v2451_v10, %v825_v47  ;;  %v846_v53 = vmul.f32 %v2451_v10, %v826_v48 }
 0x337   : > { %v855_v54 = vcombine.low %v839_v12, %v841_v51  ;;  %v871_v55 = vcombine.low %v840_v41, %v842_v17  ;;  %v856_v29 = vcombine.high %v839_v12, %v841_v51  ;;  %v872_v56 = vcombine.high %v840_v41, %v842_v17 }
 0x338   : > { %v887_v61 = vcombine.low %v843_v52, %v845_v23  ;;  %v903_v31 = vcombine.low %v844_v40, %v846_v53  ;;  %v888_v62 = vcombine.high %v843_v52, %v845_v23  ;;  %v904_v63 = vcombine.high %v844_v40, %v846_v53 }
 0x339   : > { %v2453_v33 = vpop.eup %2452  ;;  %v863_v1 = vrot.slane %v855_v54, %v2981_v60  ;;  %v879_v49 = vrot.slane %v871_v55, %v2981_v60  ;;  %v870_v2 = vrot.slane %v856_v29, %v2981_v60  ;;  %v886_v3 = vrot.slane %v872_v56, %v2981_v60 }
 0x33a   : > { %v895_v4 = vrot.slane %v887_v61, %v2981_v60  ;;  %v911_v8 = vrot.slane %v903_v31, %v2981_v60  ;;  %v902_v5 = vrot.slane %v888_v62, %v2981_v60  ;;  %v918_v9 = vrot.slane %v904_v63, %v2981_v60 }
 0x33b   : > { %v920_v11 = vcombine.high %v863_v1, %v879_v49  ;;  %v919_v13 = vcombine.low %v863_v1, %v879_v49  ;;  %v935_v15 = vcombine.low %v870_v2, %v886_v3  ;;  %v847_v26 = vmul.f32 %v2453_v33, %v827_v50 }
 0x33c   : > { %v952_v21 = vcombine.high %v895_v4, %v911_v8  ;;  %v951_v24 = vcombine.low %v895_v4, %v911_v8  ;;  %v967_v25 = vcombine.low %v902_v5, %v918_v9  ;;  %v848_v35 = vmul.f32 %v2453_v33, %v828_v58 }
 0x33d   : > { %v934_v28 = vrot.slane %v920_v11, %v2986_v14  ;;  %v3171_v30 = vrot.slane %v919_v13, %v2986_v14  ;;  %v849_v38 = vmul.f32 %v2453_v33, %v829_v59  ;;  %v850_v43 = vmul.f32 %v2453_v33, %v830_v18 }
 0x33e   : > { %v966_v39 = vrot.slane %v952_v21, %v2986_v14  ;;  %v3175_v42 = vrot.slane %v951_v24, %v2986_v14  ;;  %v851_v44 = vmul.f32 %v2453_v33, %v831_v19  ;;  %v852_v36 = vmul.f32 %v2453_v33, %v832_v20 }
 0x33f   : > { %v853_v57 = vmul.f32 %v2453_v33, %v833_v34  ;;  %v854_v22 = vmul.f32 %v2453_v33, %v834_v16  ;;  %v943_v46 = vrot.slane %v935_v15, %v2986_v14  ;;  %v975_v47 = vrot.slane %v967_v25, %v2986_v14 }
 0x340   : > { %v985_v37 = vcombine.low %v934_v28, %v966_v39  ;;  %v984_v45 = vcombine.high %v3171_v30, %v3175_v42  ;;  %v986_v48 = vcombine.high %v934_v28, %v966_v39  ;;  %v991_v50 = vcombine.low %v847_v26, %v849_v38 }
 0x341   : > { %v1007_v58 = vcombine.low %v848_v35, %v850_v43  ;;  %v1023_v59 = vcombine.low %v851_v44, %v853_v57  ;;  %v1039_v10 = vcombine.low %v852_v36, %v854_v22  ;;  %v936_v18 = vcombine.high %v870_v2, %v886_v3 }
 0x342   : > { %1137 = vrot.lane.b32.xlu0 %v985_v37, %s2670_s30  ;;  %1129 = vrot.lane.b32.xlu1 %v984_v45, %s2671_s29  ;;  %v968_v19 = vcombine.high %v902_v5, %v918_v9  ;;  %v999_v20 = vrot.slane %v991_v50, %v2981_v60  ;;  %v992_v41 = vcombine.high %v847_v26, %v849_v38  ;;  %v1215_v37 = vpop.permute.xlu0 %1214 }
 0x343   : > { %v1015_v34 = vrot.slane %v1007_v58, %v2981_v60  ;;  %v1031_v12 = vrot.slane %v1023_v59, %v2981_v60  ;;  %v987_v51 = vcombine.low %v943_v46, %v975_v47  ;;  %v988_v17 = vcombine.high %v943_v46, %v975_v47 }
 0x344   : > { %v1047_v52 = vrot.slane %v1039_v10, %v2981_v60  ;;  %v1008_v40 = vcombine.high %v848_v35, %v850_v43  ;;  %v1006_v53 = vrot.slane %v992_v41, %v2981_v60  ;;  %v1024_v54 = vcombine.high %v851_v44, %v853_v57  ;;  %v1205_v57 = vpop.permute.xlu1 %1204 }
 0x345   : > { %v1055_v23 = vcombine.low %v999_v20, %v1015_v34  ;;  %v1040_v55 = vcombine.high %v852_v36, %v854_v22  ;;  %v950_v56 = vrot.slane %v936_v18, %v2986_v14  ;;  %v982_v62 = vrot.slane %v968_v19, %v2986_v14 }
 0x346   : > { %1145 = vrot.lane.b32.xlu0 %v986_v48, %s2669_s14  ;;  %1153 = vrot.lane.b32.xlu1 %v987_v51, %s2668_s8  ;;  %v1087_v29 = vcombine.low %v1031_v12, %v1047_v52  ;;  %v1022_v61 = vrot.slane %v1008_v40, %v2981_v60  ;;  %v1038_v63 = vrot.slane %v1024_v54, %v2981_v60  ;;  %v2676_v36 = vmov 3  }
 0x347   : > { %v3193_v31 = vrot.slane %v1055_v23, %v2986_v14  ;;  %v1054_v33 = vrot.slane %v1040_v55, %v2981_v60  ;;  %v1056_v2 = vcombine.high %v999_v20, %v1015_v34  ;;  %v1088_v3 = vcombine.high %v1031_v12, %v1047_v52  ;;  %2439 = vset.pattern.permute.xlu1 %v2676_v36 }
 0x348   : > { %v1095_v1 = vrot.slane %v1087_v29, %v2986_v14  ;;  %v1071_v49 = vcombine.low %v1006_v53, %v1022_v61  ;;  %v983_v11 = vcombine.low %v3171_v30, %v3175_v42  ;;  %v989_v13 = vcombine.low %v950_v56, %v982_v62  ;;  %2440 = vset.pattern.permute.xlu0 %v2676_v36  ;;  %v1209_v22 = vpop.permute.xlu1 %1208 }
 0x349   : > { %v1103_v4 = vcombine.low %v1038_v63, %v1054_v33  ;;  %v1070_v15 = vrot.slane %v1056_v2, %v2986_v14  ;;  %v1102_v16 = vrot.slane %v1088_v3, %v2986_v14  ;;  %v1072_v25 = vcombine.high %v1006_v53, %v1022_v61 }
 0x34a   : > { %1161 = vrot.lane.b32.xlu1 %v988_v17, %s2667_s6  ;;  %v1120_v8 = vcombine.high %v3193_v31, %v1095_v1  ;;  %v1079_v5 = vrot.slane %v1071_v49, %v2986_v14  ;;  %v1119_v21 = vcombine.low %v3193_v31, %v1095_v1  ;;  %v1104_v26 = vcombine.high %v1038_v63, %v1054_v33 }
 0x34b   : > { %v1111_v9 = vrot.slane %v1103_v4, %v2986_v14  ;;  %v1121_v28 = vcombine.low %v1070_v15, %v1102_v16  ;;  %v1086_v35 = vrot.slane %v1072_v25, %v2986_v14  ;;  %v1122_v39 = vcombine.high %v1070_v15, %v1102_v16 }
 0x34c   : > { %1131 = vrot.lane.b32.xlu0 %v1120_v8, %s2671_s29  ;;  %v1118_v38 = vrot.slane %v1104_v26, %v2986_v14  ;;  %v990_v43 = vcombine.high %v950_v56, %v982_v62  ;;  %v1219_v45 = vpop.permute.xlu1 %1218  ;;  %v2447_v8 = vld [vmem:[#allocation7] sm:$0xff]  }
 0x34d   : > { %v1123_v24 = vcombine.low %v1079_v5, %v1111_v9  ;;  %v1124_v30 = vcombine.high %v1079_v5, %v1111_v9  ;;  %v2448_v5 = vld [vmem:[#allocation7 + $0x8] sm:$0xff]   ;;  %v2449_v9 = vld [vmem:[#allocation7 + $0x10] sm:$0xff]  }
 0x34e   : > { %1169 = vrot.lane.b32.xlu1 %v989_v13, %s2666_s10  ;;  %v1125_v42 = vcombine.low %v1086_v35, %v1118_v38  ;;  %v1126_v44 = vcombine.high %v1086_v35, %v1118_v38 }
 0x350   : > { %1155 = vrot.lane.b32.xlu0 %v1123_v24, %s2668_s8 }
 0x352   : > { %1139 = vrot.lane.b32.xlu1 %v1121_v28, %s2670_s30 }
 0x354   : > { %1163 = vrot.lane.b32.xlu0 %v1124_v30, %s2667_s6 }
 0x356   : > { %1147 = vrot.lane.b32.xlu1 %v1122_v39, %s2669_s14 }
 0x358   : > { %1171 = vrot.lane.b32.xlu0 %v1125_v42, %s2666_s10 }
 0x35a   : > { %1177 = vrot.lane.b32.xlu1 %v990_v43, %s2665_s28 }
 0x35c   : > { %1179 = vrot.lane.b32.xlu0 %v1126_v44, %s2665_s28 }
 0x35e   : > { %1308 = vperm.xlu1 %2439, %v2934_v6  }
 0x360   : > { %1312 = vperm.xlu0 %2440, %v2937_v7  }
 0x3b4   : > { %v1138_v46 = vpop.permute.xlu0 %1137  ;;  %v1130_v47 = vpop.permute.xlu1 %1129 }
 0x3b5   : > { %v1183_v19 = vsel %vm309_vm1, %v983_v11, %v1130_v47 }
 0x3b6   : > { %v1186_v6 = vsel %vm1185_vm4, %v1183_v19, %v1138_v46 }
 0x3b8   : > { %v1146_v48 = vpop.permute.xlu0 %1145  ;;  %v1154_v50 = vpop.permute.xlu1 %1153 }
 0x3b9   : > { %v1189_v34 = vsel %vm1188_vm5, %v1186_v6, %v1146_v48 }
 0x3ba   : > { %v1192_v52 = vsel %vm1191_vm6, %v1189_v34, %v1154_v50 }
 0x3bc   : > { %v1162_v58 = vpop.permute.xlu1 %1161 }
 0x3bd   : > { %v1195_v53 = vsel %vm1194_vm7, %v1192_v52, %v1162_v58 }
 0x3be   : > { %v1132_v59 = vpop.permute.xlu0 %1131 }
 0x3bf   : > { %v1184_v12 = vsel %vm309_vm1, %v1119_v21, %v1132_v59 }
 0x3c0   : > { %v1170_v10 = vpop.permute.xlu1 %1169 }
 0x3c1   : > { %v1198_v55 = vsel %vm1197_vm8, %v1195_v53, %v1170_v10 }
 0x3c2   : > { %v1156_v18 = vpop.permute.xlu0 %1155 }
 0x3c4   : > { %v1140_v20 = vpop.permute.xlu1 %1139 }
 0x3c5   : > { %v1187_v41 = vsel %vm1185_vm4, %v1184_v12, %v1140_v20 }
 0x3c6   : > { %v1164_v7 = vpop.permute.xlu0 %1163 }
 0x3c8   : > { %v1148_v51 = vpop.permute.xlu1 %1147 }
 0x3c9   : > { %v1190_v17 = vsel %vm1188_vm5, %v1187_v41, %v1148_v51 }
 0x3ca   : > { %v1172_v40 = vpop.permute.xlu0 %1171  ;;  %v1193_v23 = vsel %vm1191_vm6, %v1190_v17, %v1156_v18 }
 0x3cb   : > { %v1196_v54 = vsel %vm1194_vm7, %v1193_v23, %v1164_v7 }
 0x3cc   : > { %v1199_v29 = vsel %vm1197_vm8, %v1196_v54, %v1172_v40  ;;  %v1178_v56 = vpop.permute.xlu1 %1177 }
 0x3cd   : > { %v1201_v61 = vsel %vm1200_vm9, %v1198_v55, %v1178_v56 }
 0x3ce   : > { %v1180_v31 = vpop.permute.xlu0 %1179  ;;  %v1211_v62 = vmul.f32 %v1205_v57, %v1201_v61 }
 0x3cf   : > { %v1202_v63 = vsel %vm1200_vm9, %v1199_v29, %v1180_v31 }
 0x3d0   : > { %v1212_v33 = vmul.f32 %v1209_v22, %v1202_v63  ;;  %v1221_v1 = vadd.f32 %v1215_v37, %v1211_v62 }
 0x3d2   : > { %v1222_v49 = vadd.f32 %v1219_v45, %v1212_v33  ;;  %v1223_v2 = vmax.f32 %v1221_v1, 0.0 }
 0x3d4   : > { %v1224_v3 = vmax.f32 %v1222_v49, 0.0 }
 0x3d6   : > { %v1225_v4 = vpack.c.bf16 %v1224_v3, %v1223_v2 }
 0x3d8   : > { %2320 = vmatpush3.bf16.msra.mxu1 %v1225_v4 }
 0x3db   : > { %2322 = vmatmul.mubr.msk.bf16.vlgmr.msra.gmra.mrb[0].mxu1 %vm309_vm1, %v2447_v8 }
 0x3dc   : > { %2325 = vmatprep.mubr.msk.bf16.mxu1 %vm2661_vm0, %v2660_v0 }
 0x3dd   : > { %v1309_v38 = vpop.permute.xlu1 %1308 }
 0x3df   : > { %v1313_v42 = vpop.permute.xlu0 %1312 }
 0x3e3   : > { %2326 = vmatmul.mubr.msk.bf16.gmra.mrb[4].mxu1 %vm309_vm1, %v2448_v5 }
 0x3e4   : > { %2329 = vmatprep.mubr.msk.bf16.mxu1 %vm2661_vm0, %v2660_v0 }
 0x3eb   : > { %2330 = vmatmul.mubr.msk.bf16.gmra.mrb[8].mxu1 %vm309_vm1, %v2449_v9 }
 0x4ae   : > { %v1284_v11 = vpop.f32.mrb[0].mxu1 }
 0x4af   : > { %1317 = vrot.lane.b32.xlu1 %v1284_v11, %s2663_s21  ;;  %v2323_v13 = vpop.f32.mrb[1].mxu1 }
 0x4b0   : > { %v1287_v15 = vpop.f32.mrb[2].mxu1 }
 0x4b1   : > { %v2324_v16 = vpop.f32.mrb[3].mxu1 }
 0x4b3   : > { %1319 = vrot.lane.b32.xlu1 %v1287_v15, %s2663_s21  ;;  %s3516_s21 = scalar_lea.hbm %s3566_s4, %s2296_s24 }
 0x4b6   : > { %v1292_v21 = vpop.f32.mrb[4].mxu1 }
 0x4b7   : > { %v2327_v24 = vpop.f32.mrb[5].mxu1  ;;  %v1315_v36 = vadd.f32 %v1309_v38, %v1292_v21 }
 0x4b8   : > { %v1295_v25 = vpop.f32.mrb[6].mxu1 }
 0x4b9   : > { %v2328_v26 = vpop.f32.mrb[7].mxu1  ;;  %v1316_v22 = vadd.f32 %v1313_v42, %v1295_v25 }
 0x4be   : > { %v1300_v28 = vpop.f32.mrb[8].mxu1 }
 0x4bf   : > { %1325 = vrot.lane.b32.xlu0 %v1300_v28, %s2664_s23  ;;  %v2331_v30 = vpop.f32.mrb[9].mxu1 }
 0x4c0   : > { %v1303_v0 = vpop.f32.mrb[10].mxu1 }
 0x4c1   : > { %1327 = vrot.lane.b32.xlu1 %v1303_v0, %s2664_s23  ;;  %v2332_v35 = vpop.f32.mrb[11].mxu1  ;;  %s2576_s23 = scalar_lea.vmem %s3518_s7, 256 }
 0x4c2   : > { %p2577_p10 = scmp.ne.s32.totalorder %s3518_s7, %s2576_s23 }
 0x4c4   : > { %p2578_p3 = pnand %p2577_p10, %p2855_p5 }
 0x4c6   : > { %p2579_p7 = pneg %p2578_p3 }
 0x521   : > { %v1318_v39 = vpop.permute.xlu1 %1317 }
 0x522   : > { %v1321_v44 = vsel %vm2951_vm2, %v1318_v39, 0.0 }
 0x523   : > { %v1323_v37 = vadd.f32 %v1321_v44, %v1315_v36 }
 0x525   : > { %v1320_v43 = vpop.permute.xlu1 %1319 }
 0x526   : > { %v1322_v57 = vsel %vm2951_vm2, %v1320_v43, 0.0 }
 0x527   : > { %v1324_v47 = vadd.f32 %v1322_v57, %v1316_v22 }
 0x531   : > { %v1326_v45 = vpop.permute.xlu0 %1325 }
 0x532   : > { %v1329_v46 = vsel %vm2957_vm3, %v1326_v45, 0.0 }
 0x533   : > { %v1331_v48 = vadd.f32 %v1329_v46, %v1323_v37  ;;  %v1328_v50 = vpop.permute.xlu1 %1327 }
 0x534   : > { %v1330_v58 = vsel %vm2957_vm3, %v1328_v50, 0.0 }
 0x535   : > { %v1332_v59 = vadd.f32 %v1330_v58, %v1324_v47  ;;  %1335 = vrot.lane.b32.xlu0 %v1331_v48, %s2665_s28 }
 0x537   : > { %1337 = vrot.lane.b32.xlu1 %v1332_v59, %s2665_s28 }
 0x539   : > { %1341 = vrot.lane.b32.xlu0 %v1331_v48, %s2666_s10 }
 0x53b   : > { %1343 = vrot.lane.b32.xlu1 %v1332_v59, %s2666_s10 }
 0x53d   : > { %1347 = vrot.lane.b32.xlu0 %v1331_v48, %s2667_s6 }
 0x53f   : > { %1349 = vrot.lane.b32.xlu1 %v1332_v59, %s2667_s6 }
 0x541   : > { %1353 = vrot.lane.b32.xlu0 %v1331_v48, %s2668_s8 }
 0x543   : > { %1355 = vrot.lane.b32.xlu1 %v1332_v59, %s2668_s8 }
 0x545   : > { %1359 = vrot.lane.b32.xlu0 %v1331_v48, %s2669_s14 }
 0x547   : > { %1361 = vrot.lane.b32.xlu1 %v1332_v59, %s2669_s14 }
 0x549   : > { %1365 = vrot.lane.b32.xlu0 %v1331_v48, %s2670_s30 }
 0x54b   : > { %1367 = vrot.lane.b32.xlu1 %v1332_v59, %s2670_s30 }
 0x54d   : > { %1371 = vrot.lane.b32.xlu0 %v1331_v48, %s2671_s29 }
 0x54f   : > { %1373 = vrot.lane.b32.xlu1 %v1332_v59, %s2671_s29 }
 0x5a7   : > { %v1336_v27 = vpop.permute.xlu0 %1335 }
 0x5a9   : > { %v1338_v32 = vpop.permute.xlu1 %1337 }
 0x5ab   : > { %v1342_v10 = vpop.permute.xlu0 %1341 }
 0x5ac   : > { %v1377_v51 = vcombine.low %v1331_v48, %v1342_v10  ;;  %v1378_v52 = vcombine.high %v1331_v48, %v1342_v10 }
 0x5ad   : > { %v1344_v18 = vpop.permute.xlu1 %1343 }
 0x5ae   : > { %v1513_v40 = vcombine.low %v1332_v59, %v1344_v18  ;;  %v1514_v23 = vcombine.high %v1332_v59, %v1344_v18  ;;  %v1385_v56 = vrot.slane %v1377_v51, %v2981_v60  ;;  %v1392_v63 = vrot.slane %v1378_v52, %v2981_v60 }
 0x5af   : > { %v1348_v19 = vpop.permute.xlu0 %1347 }
 0x5b0   : > { %v1393_v34 = vcombine.low %v1336_v27, %v1348_v19  ;;  %v1394_v41 = vcombine.high %v1336_v27, %v1348_v19  ;;  %v1521_v33 = vrot.slane %v1513_v40, %v2981_v60  ;;  %v1528_v1 = vrot.slane %v1514_v23, %v2981_v60 }
 0x5b1   : > { %v1350_v20 = vpop.permute.xlu1 %1349 }
 0x5b2   : > { %v1401_v53 = vrot.slane %v1393_v34, %v2981_v60  ;;  %v1408_v55 = vrot.slane %v1394_v41, %v2981_v60  ;;  %v1529_v29 = vcombine.low %v1338_v32, %v1350_v20  ;;  %v1530_v61 = vcombine.high %v1338_v32, %v1350_v20 }
 0x5b3   : > { %v1354_v6 = vpop.permute.xlu0 %1353 }
 0x5b4   : > { %v1441_v49 = vcombine.low %v1385_v56, %v1401_v53  ;;  %v1442_v2 = vcombine.high %v1385_v56, %v1401_v53  ;;  %v1457_v8 = vcombine.low %v1392_v63, %v1408_v55  ;;  %v1537_v5 = vrot.slane %v1529_v29, %v2981_v60 }
 0x5b5   : > { %v1356_v7 = vpop.permute.xlu1 %1355  ;;  %v1544_v13 = vrot.slane %v1530_v61, %v2981_v60  ;;  %v1458_v38 = vcombine.high %v1392_v63, %v1408_v55 }
 0x5b6   : > { %v1449_v0 = vrot.slane %v1441_v49, %v2986_v14  ;;  %v1456_v35 = vrot.slane %v1442_v2, %v2986_v14  ;;  %v1577_v42 = vcombine.low %v1521_v33, %v1537_v5  ;;  %v1578_v43 = vcombine.high %v1521_v33, %v1537_v5 }
 0x5b7   : > { %v1360_v12 = vpop.permute.xlu0 %1359  ;;  %v1593_v46 = vcombine.low %v1528_v1, %v1544_v13  ;;  %v1594_v47 = vcombine.high %v1528_v1, %v1544_v13  ;;  %v1465_v10 = vrot.slane %v1457_v8, %v2986_v14 }
 0x5b8   : > { %v1592_v41 = vrot.slane %v1578_v43, %v2986_v14 }
 0x5b9   : > { %v1362_v17 = vpop.permute.xlu1 %1361  ;;  %v1601_v51 = vrot.slane %v1593_v46, %v2986_v14 }
 0x5bb   : > { %v1366_v54 = vpop.permute.xlu0 %1365 }
 0x5bc   : > { %v1409_v31 = vcombine.low %v1354_v6, %v1366_v54  ;;  %v1410_v3 = vcombine.high %v1354_v6, %v1366_v54  ;;  %v1472_v6 = vrot.slane %v1458_v38, %v2986_v14 }
 0x5bd   : > { %v1368_v62 = vpop.permute.xlu1 %1367 }
 0x5be   : > { %v1417_v15 = vrot.slane %v1409_v31, %v2981_v60  ;;  %v1545_v16 = vcombine.low %v1356_v7, %v1368_v62  ;;  %v1546_v21 = vcombine.high %v1356_v7, %v1368_v62  ;;  %v1424_v39 = vrot.slane %v1410_v3, %v2981_v60 }
 0x5bf   : > { %v1372_v4 = vpop.permute.xlu0 %1371  ;;  %v1585_v7 = vrot.slane %v1577_v42, %v2986_v14 }
 0x5c0   : > { %v1425_v9 = vcombine.low %v1360_v12, %v1372_v4  ;;  %v1426_v11 = vcombine.high %v1360_v12, %v1372_v4  ;;  %v1553_v57 = vrot.slane %v1545_v16, %v2981_v60  ;;  %v1560_v48 = vrot.slane %v1546_v21, %v2981_v60 }
 0x5c1   : > { %v1374_v24 = vpop.permute.xlu1 %1373 }
 0x5c2   : > { %v1433_v25 = vrot.slane %v1425_v9, %v2981_v60  ;;  %v1440_v26 = vrot.slane %v1426_v11, %v2981_v60  ;;  %v1561_v28 = vcombine.low %v1362_v17, %v1374_v24  ;;  %v1562_v30 = vcombine.high %v1362_v17, %v1374_v24 }
 0x5c3   : > { %v1608_v17 = vrot.slane %v1594_v47, %v2986_v14 }
 0x5c4   : > { %v1473_v44 = vcombine.low %v1417_v15, %v1433_v25  ;;  %v1474_v36 = vcombine.high %v1417_v15, %v1433_v25  ;;  %v1489_v22 = vcombine.low %v1424_v39, %v1440_v26  ;;  %v1569_v37 = vrot.slane %v1561_v28, %v2981_v60 }
 0x5c5   : > { %v1576_v45 = vrot.slane %v1562_v30, %v2981_v60  ;;  %v1490_v59 = vcombine.high %v1424_v39, %v1440_v26 }
 0x5c6   : > { %v1481_v50 = vrot.slane %v1473_v44, %v2986_v14  ;;  %v1488_v58 = vrot.slane %v1474_v36, %v2986_v14  ;;  %v1609_v27 = vcombine.low %v1553_v57, %v1569_v37  ;;  %v1610_v32 = vcombine.high %v1553_v57, %v1569_v37 }
 0x5c7   : > { %v1625_v20 = vcombine.low %v1560_v48, %v1576_v45  ;;  %v1497_v34 = vrot.slane %v1489_v22, %v2986_v14  ;;  %v1504_v40 = vrot.slane %v1490_v59, %v2986_v14  ;;  %v1626_v53 = vcombine.high %v1560_v48, %v1576_v45 }
 0x5c8   : > { %v3289_v18 = vcombine.low %v1449_v0, %v1481_v50  ;;  %v3291_v19 = vcombine.high %v1449_v0, %v1481_v50  ;;  %v1617_v12 = vrot.slane %v1609_v27, %v2986_v14  ;;  %v1624_v52 = vrot.slane %v1610_v32, %v2986_v14 }
 0x5c9   : > { %v3302_v23 = vcombine.low %v1456_v35, %v1488_v58  ;;  %v1633_v56 = vrot.slane %v1625_v20, %v2986_v14  ;;  %v3313_v31 = vcombine.high %v1456_v35, %v1488_v58  ;;  %v3315_v62 = vcombine.low %v1465_v10, %v1497_v34 }
 0x5ca   : > { %v3304_v54 = vcombine.low %v1585_v7, %v1617_v12  ;;  %v1649_v55 = vsel %vm309_vm1, %v3289_v18, 0.0  ;;  %v1650_v29 = vsel %vm309_vm1, %v3291_v19, 0.0  ;;  %v3311_v61 = vcombine.high %v1585_v7, %v1617_v12 }
 0x5cb   : > { %v3317_v63 = vcombine.high %v1465_v10, %v1497_v34  ;;  %v1683_v33 = vmul.f32 %v3289_v18, %v3289_v18  ;;  %v1684_v1 = vmul.f32 %v3291_v19, %v3291_v19  ;;  %v3323_v49 = vcombine.low %v1592_v41, %v1624_v52 }
 0x5cc   : > { %v1666_v2 = vsel %vm309_vm1, %v3304_v54, 0.0  ;;  %v1667_v3 = vsel %vm309_vm1, %v3311_v61, 0.0  ;;  %v1685_v4 = vmul.f32 %v3302_v23, %v3302_v23  ;;  %v1640_v8 = vrot.slane %v1626_v53, %v2986_v14 }
 0x5cd   : > { %v3332_v5 = vcombine.high %v1592_v41, %v1624_v52  ;;  %v1651_v9 = vadd.f32 %v1650_v29, %v1649_v55  ;;  %v3334_v11 = vcombine.low %v1601_v51, %v1633_v56  ;;  %v3336_v13 = vcombine.high %v1601_v51, %v1633_v56 }
 0x5ce   : > { %v3338_v15 = vcombine.low %v1472_v6, %v1504_v40  ;;  %v1652_v16 = vsel %vm309_vm1, %v3302_v23, 0.0  ;;  %v1691_v21 = vmul.f32 %v3304_v54, %v3304_v54  ;;  %v1692_v24 = vmul.f32 %v3311_v61, %v3311_v61 }
 0x5cf   : > { %v1653_v25 = vadd.f32 %v1652_v16, %v1651_v9  ;;  %v1668_v26 = vadd.f32 %v1667_v3, %v1666_v2  ;;  %v1693_v28 = vmul.f32 %v3323_v49, %v3323_v49  ;;  %v3348_v30 = vcombine.high %v1472_v6, %v1504_v40 }
 0x5d0   : > { %v1654_v0 = vsel %vm309_vm1, %v3313_v31, 0.0  ;;  %v1669_v35 = vsel %vm309_vm1, %v3323_v49, 0.0  ;;  %v1656_v39 = vsel %vm309_vm1, %v3315_v62, 0.0  ;;  %v1658_v42 = vsel %vm309_vm1, %v3317_v63, 0.0 }
 0x5d1   : > { %v1655_v38 = vadd.f32 %v1654_v0, %v1653_v25  ;;  %v1670_v43 = vadd.f32 %v1669_v35, %v1668_v26  ;;  %v1660_v44 = vsel %vm309_vm1, %v3338_v15, 0.0  ;;  %v3360_v36 = vcombine.low %v1608_v17, %v1640_v8 }
 0x5d2   : > { %v1671_v57 = vsel %vm309_vm1, %v3332_v5, 0.0  ;;  %v1686_v22 = vmul.f32 %v3313_v31, %v3313_v31  ;;  %v1699_v46 = vsel %vm309_vm1, %v1683_v33, 0.0  ;;  %v1700_v47 = vsel %vm309_vm1, %v1684_v1, 0.0 }
 0x5d3   : > { %v1657_v37 = vadd.f32 %v1656_v39, %v1655_v38  ;;  %v1672_v45 = vadd.f32 %v1671_v57, %v1670_v43  ;;  %v1662_v48 = vsel %vm309_vm1, %v3348_v30, 0.0  ;;  %v3370_v50 = vcombine.high %v1608_v17, %v1640_v8 }
 0x5d4   : > { %v1673_v58 = vsel %vm309_vm1, %v3334_v11, 0.0  ;;  %v1701_v59 = vadd.f32 %v1700_v47, %v1699_v46  ;;  %v1687_v10 = vmul.f32 %v3315_v62, %v3315_v62  ;;  %v1702_v20 = vsel %vm309_vm1, %v1685_v4, 0.0 }
 0x5d5   : > { %v1659_v27 = vadd.f32 %v1658_v42, %v1657_v37  ;;  %v1674_v32 = vadd.f32 %v1673_v58, %v1672_v45  ;;  %v1675_v6 = vsel %vm309_vm1, %v3336_v13, 0.0  ;;  %v1677_v7 = vsel %vm309_vm1, %v3360_v36, 0.0 }
 0x5d6   : > { %v1688_v34 = vmul.f32 %v3317_v63, %v3317_v63  ;;  %v1703_v12 = vadd.f32 %v1702_v20, %v1701_v59  ;;  %v1689_v17 = vmul.f32 %v3338_v15, %v3338_v15  ;;  %v1704_v52 = vsel %vm309_vm1, %v1686_v22, 0.0 }
 0x5d7   : > { %v1661_v41 = vadd.f32 %v1660_v44, %v1659_v27  ;;  %v1676_v51 = vadd.f32 %v1675_v6, %v1674_v32  ;;  %v1694_v53 = vmul.f32 %v3332_v5, %v3332_v5  ;;  %v1716_v55 = vsel %vm309_vm1, %v1691_v21, 0.0  ;;  %v2458_v32 = vld [vmem:[#allocation8] sm:$0xff] }
 0x5d8   : > { %v1705_v40 = vadd.f32 %v1704_v52, %v1703_v12  ;;  %v1717_v29 = vsel %vm309_vm1, %v1692_v24, 0.0  ;;  %v1706_v1 = vsel %vm309_vm1, %v1687_v10, 0.0  ;;  %v1679_v3 = vsel %vm309_vm1, %v3370_v50, 0.0  ;;  %v2459_v10 = vld [vmem:[#allocation8 + $0x8] sm:$0xff] }
 0x5d9   : > { %v1663_v56 = vadd.f32 %v1662_v48, %v1661_v41  ;;  %v1678_v33 = vadd.f32 %v1677_v7, %v1676_v51  ;;  %v1718_v2 = vadd.f32 %v1717_v29, %v1716_v55  ;;  %v1695_v8 = vmul.f32 %v3334_v11, %v3334_v11 }
 0x5da   : > { %v1707_v4 = vadd.f32 %v1706_v1, %v1705_v40  ;;  %v1719_v9 = vsel %vm309_vm1, %v1693_v28, 0.0  ;;  %v1690_v21 = vmul.f32 %v3348_v30, %v3348_v30  ;;  %v1708_v24 = vsel %vm309_vm1, %v1688_v34, 0.0 }
 0x5db   : > { %1664 = vadd.xlane.f32.xlu0 %v1663_v56  ;;  %v1680_v16 = vadd.f32 %v1679_v3, %v1678_v33  ;;  %v1720_v25 = vadd.f32 %v1719_v9, %v1718_v2  ;;  %v1696_v0 = vmul.f32 %v3336_v13, %v3336_v13  ;;  %v1721_v35 = vsel %vm309_vm1, %v1694_v53, 0.0 }
 0x5dc   : > { %v1709_v26 = vadd.f32 %v1708_v24, %v1707_v4  ;;  %v1710_v38 = vsel %vm309_vm1, %v1689_v17, 0.0  ;;  %v1697_v28 = vmul.f32 %v3360_v36, %v3360_v36  ;;  %v1723_v43 = vsel %vm309_vm1, %v1695_v8, 0.0 }
 0x5dd   : > { %1681 = vadd.xlane.f32.xlu1 %v1680_v16  ;;  %v1722_v39 = vadd.f32 %v1721_v35, %v1720_v25  ;;  %v1712_v44 = vsel %vm309_vm1, %v1690_v21, 0.0  ;;  %v1698_v37 = vmul.f32 %v3370_v50, %v3370_v50  ;;  %v1725_v45 = vsel %vm309_vm1, %v1696_v0, 0.0 }
 0x5de   : > { %v1711_v42 = vadd.f32 %v1710_v38, %v1709_v26  ;;  %v1727_v47 = vsel %vm309_vm1, %v1697_v28, 0.0  ;;  %v2677_v27 = vmov 4   ;;  %v2678_v20 = vmov 5  }
 0x5df   : > { %v1724_v57 = vadd.f32 %v1723_v43, %v1722_v39  ;;  %v1729_v58 = vsel %vm309_vm1, %v1698_v37, 0.0  ;;  %2441 = vset.pattern.permute.xlu1 %v2677_v27  ;;  %2442 = vset.pattern.permute.xlu0 %v2678_v20 }
 0x5e0   : > { %v1713_v22 = vadd.f32 %v1712_v44, %v1711_v42 }
 0x5e1   : > { %v1726_v46 = vadd.f32 %v1725_v45, %v1724_v57 }
 0x5e2   : > { %1714 = vadd.xlane.f32.xlu0 %v1713_v22 }
 0x5e3   : > { %v1728_v48 = vadd.f32 %v1727_v47, %v1726_v46 }
 0x5e5   : > { %v1730_v59 = vadd.f32 %v1729_v58, %v1728_v48 }
 0x5e7   : > { %1731 = vadd.xlane.f32.xlu0 %v1730_v59 }
 0x5ee   : > { %2122 = vperm.xlu1 %2441, %v2458_v32  }
 0x5f2   : > { %2126 = vperm.xlu1 %2441, %v2459_v10  }
 0x5f6   : > { %2443 = vset.pattern.permute.xlu1 %v2678_v20 }
 0x5f7   : > { %2136 = vperm.xlu1 %2443, %v2459_v10  }
 0x5fd   : > { %2132 = vperm.xlu0 %2442, %v2458_v32  }
 0x668   : > { %v1665_v6 = vpop.xlane.xlu0 %1664 }
 0x669   : > { %v1733_v7 = vmul.f32 0.0078125, %v1665_v6 }
 0x66a   : > { %v1682_v34 = vpop.xlane.xlu1 %1681 }
 0x66b   : > { %v1737_v41 = vmul.f32 %v1733_v7, %v1733_v7  ;;  %v3412_v17 = vmul.f32 0.0078125, %v1682_v34  ;;  %v1743_v3 = vsub.f32 %v3289_v18, %v1733_v7  ;;  %v1744_v4 = vsub.f32 %v3291_v19, %v1733_v7 }
 0x66c   : > { %v1745_v8 = vsub.f32 %v3302_v23, %v1733_v7  ;;  %v1746_v9 = vsub.f32 %v3313_v31, %v1733_v7  ;;  %v1747_v16 = vsub.f32 %v3315_v62, %v1733_v7  ;;  %v1748_v21 = vsub.f32 %v3317_v63, %v1733_v7 }
 0x66d   : > { %v1738_v29 = vmul.f32 %v3412_v17, %v3412_v17  ;;  %v1749_v24 = vsub.f32 %v3338_v15, %v1733_v7  ;;  %v1750_v25 = vsub.f32 %v3348_v30, %v1733_v7  ;;  %v1751_v26 = vsub.f32 %v3304_v54, %v3412_v17 }
 0x66e   : > { %v1752_v18 = vsub.f32 %v3311_v61, %v3412_v17  ;;  %v1753_v19 = vsub.f32 %v3323_v49, %v3412_v17  ;;  %v1754_v31 = vsub.f32 %v3332_v5, %v3412_v17  ;;  %v1755_v62 = vsub.f32 %v3334_v11, %v3412_v17 }
 0x66f   : > { %v1715_v12 = vpop.xlane.xlu0 %1714  ;;  %v1756_v63 = vsub.f32 %v3336_v13, %v3412_v17  ;;  %v1757_v15 = vsub.f32 %v3360_v36, %v3412_v17  ;;  %v1758_v20 = vsub.f32 %v3370_v50, %v3412_v17 }
 0x670   : > { %v1735_v51 = vmul.f32 0.0078125, %v1715_v12 }
 0x672   : > { %v1739_v52 = vsub.f32 %v1735_v51, %v1737_v41 }
 0x674   : > { %v1741_v40 = vmax.f32 %v1739_v52, 0.0  ;;  %v1732_v53 = vpop.xlane.xlu0 %1731 }
 0x675   : > { %v1736_v55 = vmul.f32 0.0078125, %v1732_v53 }
 0x676   : > { %v1759_v56 = vadd.f32 1e-05, %v1741_v40 }
 0x677   : > { %v1740_v33 = vsub.f32 %v1736_v55, %v1738_v29 }
 0x678   : > { %2454 = vrsqrt.f32 %v1759_v56 }
 0x679   : > { %v1742_v1 = vmax.f32 %v1740_v33, 0.0 }
 0x67b   : > { %v1760_v2 = vadd.f32 1e-05, %v1742_v1 }
 0x67d   : > { %2456 = vrsqrt.f32 %v1760_v2 }
 0x682   : > { %v2455_v23 = vpop.eup %2454 }
 0x683   : > { %v1763_v54 = vmul.f32 %v2455_v23, %v1743_v3  ;;  %v1764_v30 = vmul.f32 %v2455_v23, %v1744_v4  ;;  %v1765_v0 = vmul.f32 %v2455_v23, %v1745_v8  ;;  %v1766_v61 = vmul.f32 %v2455_v23, %v1746_v9 }
 0x684   : > { %v1767_v35 = vmul.f32 %v2455_v23, %v1747_v16  ;;  %v1768_v38 = vmul.f32 %v2455_v23, %v1748_v21  ;;  %v1769_v49 = vmul.f32 %v2455_v23, %v1749_v24  ;;  %v1770_v39 = vmul.f32 %v2455_v23, %v1750_v25 }
 0x685   : > { %v1779_v42 = vcombine.low %v1763_v54, %v1765_v0  ;;  %v1795_v28 = vcombine.low %v1764_v30, %v1766_v61  ;;  %v1780_v5 = vcombine.high %v1763_v54, %v1765_v0  ;;  %v1796_v43 = vcombine.high %v1764_v30, %v1766_v61 }
 0x686   : > { %v1811_v44 = vcombine.low %v1767_v35, %v1769_v49  ;;  %v1827_v11 = vcombine.low %v1768_v38, %v1770_v39  ;;  %v1812_v57 = vcombine.high %v1767_v35, %v1769_v49  ;;  %v1828_v22 = vcombine.high %v1768_v38, %v1770_v39 }
 0x687   : > { %v2457_v13 = vpop.eup %2456  ;;  %v1787_v37 = vrot.slane %v1779_v42, %v2981_v60  ;;  %v1803_v36 = vrot.slane %v1795_v28, %v2981_v60  ;;  %v1794_v45 = vrot.slane %v1780_v5, %v2981_v60  ;;  %v1810_v46 = vrot.slane %v1796_v43, %v2981_v60 }
 0x688   : > { %v1819_v47 = vrot.slane %v1811_v44, %v2981_v60  ;;  %v1835_v48 = vrot.slane %v1827_v11, %v2981_v60  ;;  %v1826_v58 = vrot.slane %v1812_v57, %v2981_v60  ;;  %v1842_v59 = vrot.slane %v1828_v22, %v2981_v60 }
 0x689   : > { %v1844_v27 = vcombine.high %v1787_v37, %v1803_v36  ;;  %v1843_v32 = vcombine.low %v1787_v37, %v1803_v36  ;;  %v1859_v10 = vcombine.low %v1794_v45, %v1810_v46  ;;  %v1771_v12 = vmul.f32 %v2457_v13, %v1751_v26 }
 0x68a   : > { %v1876_v6 = vcombine.high %v1819_v47, %v1835_v48  ;;  %v1875_v7 = vcombine.low %v1819_v47, %v1835_v48  ;;  %v1891_v34 = vcombine.low %v1826_v58, %v1842_v59  ;;  %v1772_v52 = vmul.f32 %v2457_v13, %v1752_v18 }
 0x68b   : > { %v1858_v41 = vrot.slane %v1844_v27, %v2986_v14  ;;  %v3450_v51 = vrot.slane %v1843_v32, %v2986_v14  ;;  %v1773_v40 = vmul.f32 %v2457_v13, %v1753_v19  ;;  %v1774_v29 = vmul.f32 %v2457_v13, %v1754_v31 }
 0x68c   : > { %v1890_v53 = vrot.slane %v1876_v6, %v2986_v14  ;;  %v3454_v55 = vrot.slane %v1875_v7, %v2986_v14  ;;  %v1775_v56 = vmul.f32 %v2457_v13, %v1755_v62  ;;  %v1776_v33 = vmul.f32 %v2457_v13, %v1756_v63 }
 0x68d   : > { %v1777_v50 = vmul.f32 %v2457_v13, %v1757_v15  ;;  %v1778_v17 = vmul.f32 %v2457_v13, %v1758_v20  ;;  %v1867_v3 = vrot.slane %v1859_v10, %v2986_v14  ;;  %v1899_v4 = vrot.slane %v1891_v34, %v2986_v14 }
 0x68e   : > { %v1909_v1 = vcombine.low %v1858_v41, %v1890_v53  ;;  %v1908_v2 = vcombine.high %v3450_v51, %v3454_v55  ;;  %v1910_v8 = vcombine.high %v1858_v41, %v1890_v53  ;;  %v1915_v9 = vcombine.low %v1771_v12, %v1773_v40  ;;  %v2133_v53 = vpop.permute.xlu0 %2132 }
 0x68f   : > { %v1931_v16 = vcombine.low %v1772_v52, %v1774_v29  ;;  %v1947_v21 = vcombine.low %v1775_v56, %v1777_v50  ;;  %v1963_v24 = vcombine.low %v1776_v33, %v1778_v17  ;;  %v1860_v25 = vcombine.high %v1794_v45, %v1810_v46 }
 0x690   : > { %2061 = vrot.lane.b32.xlu0 %v1909_v1, %s2670_s30  ;;  %2053 = vrot.lane.b32.xlu1 %v1908_v2, %s2671_s29  ;;  %v1892_v26 = vcombine.high %v1826_v58, %v1842_v59  ;;  %v1923_v18 = vrot.slane %v1915_v9, %v2981_v60  ;;  %v1916_v31 = vcombine.high %v1771_v12, %v1773_v40 }
 0x691   : > { %v1939_v19 = vrot.slane %v1931_v16, %v2981_v60  ;;  %v1955_v23 = vrot.slane %v1947_v21, %v2981_v60  ;;  %v1911_v62 = vcombine.low %v1867_v3, %v1899_v4  ;;  %v1912_v63 = vcombine.high %v1867_v3, %v1899_v4 }
 0x692   : > { %v1971_v15 = vrot.slane %v1963_v24, %v2981_v60  ;;  %v1932_v54 = vcombine.high %v1772_v52, %v1774_v29  ;;  %v1930_v0 = vrot.slane %v1916_v31, %v2981_v60  ;;  %v1948_v61 = vcombine.high %v1775_v56, %v1777_v50  ;;  %v2123_v52 = vpop.permute.xlu1 %2122 }
 0x693   : > { %v1979_v30 = vcombine.low %v1923_v18, %v1939_v19  ;;  %v1964_v35 = vcombine.high %v1776_v33, %v1778_v17  ;;  %v1874_v49 = vrot.slane %v1860_v25, %v2986_v14  ;;  %v1906_v28 = vrot.slane %v1892_v26, %v2986_v14 }
 0x694   : > { %2069 = vrot.lane.b32.xlu0 %v1910_v8, %s2669_s14  ;;  %2077 = vrot.lane.b32.xlu1 %v1911_v62, %s2668_s8  ;;  %v2011_v38 = vcombine.low %v1955_v23, %v1971_v15  ;;  %v1946_v39 = vrot.slane %v1932_v54, %v2981_v60  ;;  %v1962_v5 = vrot.slane %v1948_v61, %v2981_v60 }
 0x695   : > { %v1987_v42 = vrot.slane %v1979_v30, %v2986_v14  ;;  %v1978_v43 = vrot.slane %v1964_v35, %v2981_v60  ;;  %v1980_v57 = vcombine.high %v1923_v18, %v1939_v19  ;;  %v2012_v22 = vcombine.high %v1955_v23, %v1971_v15 }
 0x696   : > { %v2019_v44 = vrot.slane %v2011_v38, %v2986_v14  ;;  %v1995_v11 = vcombine.low %v1930_v0, %v1946_v39  ;;  %v1907_v46 = vcombine.low %v3450_v51, %v3454_v55  ;;  %v1913_v60 = vcombine.low %v1874_v49, %v1906_v28  ;;  %v2127_v40 = vpop.permute.xlu1 %2126 }
 0x697   : > { %v2027_v13 = vcombine.low %v1962_v5, %v1978_v43  ;;  %v1994_v48 = vrot.slane %v1980_v57, %v2986_v14  ;;  %v2026_v58 = vrot.slane %v2012_v22, %v2986_v14  ;;  %v1996_v27 = vcombine.high %v1930_v0, %v1946_v39 }
 0x698   : > { %2085 = vrot.lane.b32.xlu1 %v1912_v63, %s2667_s6  ;;  %v2044_v37 = vcombine.high %v1987_v42, %v2019_v44  ;;  %v2003_v36 = vrot.slane %v1995_v11, %v2986_v14  ;;  %v2043_v47 = vcombine.low %v1987_v42, %v2019_v44  ;;  %v2028_v32 = vcombine.high %v1962_v5, %v1978_v43  ;;  %v2460_v42 = vld [vmem:[%s2912_s9] sm:$0xff]  ;;  %v2461_v5 = vld [vmem:[%s2912_s9 + $0x8] sm:$0xff]  ;;  %s2580_s9 = sshll.u32 %s2679_s12, 4  ;;  %s2581_s9 = int_to_ptr.vmem [resolvable:$false] %s2580_s9 }
 0x699   : > { %v2035_v45 = vrot.slane %v2027_v13, %v2986_v14  ;;  %v2045_v10 = vcombine.low %v1994_v48, %v2026_v58  ;;  %v2010_v6 = vrot.slane %v1996_v27, %v2986_v14  ;;  %v2046_v34 = vcombine.high %v1994_v48, %v2026_v58  ;;  %p2583_p12 = scmp.lt.s32.totalorder %s3518_s7, %s2581_s9 }
 0x69a   : > { %2055 = vrot.lane.b32.xlu0 %v2044_v37, %s2671_s29  ;;  %v2042_v7 = vrot.slane %v2028_v32, %v2986_v14  ;;  %v1914_v41 = vcombine.high %v1874_v49, %v1906_v28  ;;  %v2137_v55 = vpop.permute.xlu1 %2136 }
 0x69b   : > { %v2047_v59 = vcombine.low %v2003_v36, %v2035_v45  ;;  %v2048_v20 = vcombine.high %v2003_v36, %v2035_v45 }
 0x69c   : > { %2093 = vrot.lane.b32.xlu1 %v1913_v60, %s2666_s10  ;;  %v2049_v12 = vcombine.low %v2010_v6, %v2042_v7  ;;  %v2050_v51 = vcombine.high %v2010_v6, %v2042_v7 }
 0x69e   : > { %2079 = vrot.lane.b32.xlu0 %v2047_v59, %s2668_s8 }
 0x6a0   : > { %2063 = vrot.lane.b32.xlu1 %v2045_v10, %s2670_s30 }
 0x6a2   : > { %2087 = vrot.lane.b32.xlu0 %v2048_v20, %s2667_s6 }
 0x6a4   : > { %2071 = vrot.lane.b32.xlu1 %v2046_v34, %s2669_s14 }
 0x6a6   : > { %2095 = vrot.lane.b32.xlu0 %v2049_v12, %s2666_s10 }
 0x6a8   : > { %2101 = vrot.lane.b32.xlu1 %v1914_v41, %s2665_s28 }
 0x6aa   : > { %2103 = vrot.lane.b32.xlu0 %v2050_v51, %s2665_s28  ;;  %s2582_s28 = scalar_lea.vmem %s2581_s9, 512 }
 0x6ab   : > { %p2584_p2 = scmp.lt.s32.totalorder %s2582_s28, %s2576_s23 }
 0x6ad   : > { %p2585_p1 = por %p2584_p2, %p2583_p12 }
 0x6af   : > { %p2586_p4 = pnand %p2585_p1, %p2579_p7 }
 0x702   : > { %v2062_v29 = vpop.permute.xlu0 %2061  ;;  %v2054_v14 = vpop.permute.xlu1 %2053 }
 0x703   : > { %v2107_v3 = vsel %vm309_vm1, %v1907_v46, %v2054_v14 }
 0x704   : > { %v2109_v8 = vsel %vm1185_vm4, %v2107_v3, %v2062_v29 }
 0x706   : > { %v2070_v56 = vpop.permute.xlu0 %2069  ;;  %v2078_v33 = vpop.permute.xlu1 %2077 }
 0x707   : > { %v2111_v16 = vsel %vm1188_vm5, %v2109_v8, %v2070_v56 }
 0x708   : > { %v2113_v18 = vsel %vm1191_vm6, %v2111_v16, %v2078_v33 }
 0x70a   : > { %v2086_v50 = vpop.permute.xlu1 %2085 }
 0x70b   : > { %v2115_v31 = vsel %vm1194_vm7, %v2113_v18, %v2086_v50 }
 0x70c   : > { %v2056_v17 = vpop.permute.xlu0 %2055 }
 0x70d   : > { %v2108_v21 = vsel %vm309_vm1, %v2043_v47, %v2056_v17 }
 0x70e   : > { %v2094_v1 = vpop.permute.xlu1 %2093 }
 0x70f   : > { %v2117_v63 = vsel %vm1197_vm8, %v2115_v31, %v2094_v1 }
 0x710   : > { %v2080_v2 = vpop.permute.xlu0 %2079 }
 0x712   : > { %v2064_v4 = vpop.permute.xlu1 %2063 }
 0x713   : > { %v2110_v24 = vsel %vm1185_vm4, %v2108_v21, %v2064_v4 }
 0x714   : > { %v2088_v9 = vpop.permute.xlu0 %2087 }
 0x716   : > { %v2072_v25 = vpop.permute.xlu1 %2071 }
 0x717   : > { %v2112_v26 = vsel %vm1188_vm5, %v2110_v24, %v2072_v25 }
 0x718   : > { %v2096_v19 = vpop.permute.xlu0 %2095  ;;  %v2114_v23 = vsel %vm1191_vm6, %v2112_v26, %v2080_v2 }
 0x719   : > { %v2116_v62 = vsel %vm1194_vm7, %v2114_v23, %v2088_v9 }
 0x71a   : > { %v2118_v15 = vsel %vm1197_vm8, %v2116_v62, %v2096_v19  ;;  %v2102_v54 = vpop.permute.xlu1 %2101 }
 0x71b   : > { %v2119_v30 = vsel %vm1200_vm9, %v2117_v63, %v2102_v54 }
 0x71c   : > { %v2104_v0 = vpop.permute.xlu0 %2103  ;;  %v2129_v61 = vmul.f32 %v2123_v52, %v2119_v30 }
 0x71d   : > { %v2120_v35 = vsel %vm1200_vm9, %v2118_v15, %v2104_v0 }
 0x71e   : > { %v2130_v38 = vmul.f32 %v2127_v40, %v2120_v35  ;;  %v2139_v49 = vadd.f32 %v2133_v53, %v2129_v61 }
 0x720   : > { %v2140_v39 = vadd.f32 %v2137_v55, %v2130_v38  ;;  %v2141_v28 = vadd.f32 %v2460_v42, %v2139_v49 }
 0x722   : > { %v2142_v43 = vadd.f32 %v2461_v5, %v2140_v39  ;;  %v2143_v44 = vmax.f32 %v2141_v28, 0.0 }
 0x724   : > { %v2144_v11 = vmax.f32 %v2142_v43, 0.0  ;;  %2145 = vst [vmem:[%s259_s5] sm:$0xff] %v2143_v44 }
 0x726   : > { %2146 = vst [vmem:[%s259_s5 + $0x8] sm:$0xff] %v2144_v11 }
 0x727   : > { %2589 = shalt.err (!%p2586_p4)
}
 0x728   : > { %s2590_s10 = scalar_lea.hbm %s3516_s21, 256  ;;  %s2594_s14 = scalar_lea.hbm %s3566_s4, 512 }
 0x729   : > { %p2591_p9 = scmp.ne.s32.totalorder %s3516_s21, %s2590_s10  ;;  %p2595_p8 = scmp.lt.u32.totalorder %s3516_s21, %s3566_s4 }
 0x72a   : > { %p2596_p13 = scmp.lt.u32.totalorder %s2594_s14, %s2590_s10  ;;  %p2598_p10 = scmp.lt.u32.totalorder %s2590_s10, %s3516_s21 }
 0x72b   : > { %p2592_p0 = pnand %p2591_p9, %p2855_p5 }
 0x72c   : > { %p2597_p6 = por %p2596_p13, %p2595_p8 }
 0x72d   : > { %p2593_p11 = pneg %p2592_p0 }
 0x72e   : > { %p2599_p3 = por %p2598_p10, %p2597_p6 }
 0x730   : > { %p2600_p7 = pnand %p2599_p3, %p2593_p11 }
 0x732   : > { %2603 = shalt.err (!%p2600_p7)
}
 0x733   : > { %s2680_s24 = smov 128   ;;  %s2681_s5 = smov 8  }
 0x734   : > { %2347 = dma.vmem_to_hbm [thread:$0]  (%p2855_p5), %s3518_s7, 256, %s3516_s21, %s2148_s19, %s2680_s24, %s2680_s24, %s2681_s5  }
 0x735 PF: > { %s2176_s25 = sand.u32 1, %s2638_s15   ;;  %p3588_p12 = scmp.ne.s32.totalorder %s3571_s22, 0 }
 0x736   : > { %p3589_p2 = scmp.ge.s32.totalorder %s2650_s18, 2  ;;  %s2177_s27 = scalar_lea.sflag [#allocation4], %s2176_s25 }
 0x738   : > { %p2364_p1 = pnand %p3589_p2, %p3588_p12 }
 0x73a   : > { %2633 = dma.done.wait (!%p2364_p1), %s2177_s27, 256  }
 0x73b   : > { %2635 = vsyncadd (!%p2364_p1), %s2177_s27, 4294967040  ;;  %p19_p4 = scmp.ge.s32.totalorder %s2841_s11, 4   ;;  %s3590_s15 = smov %s2642_s16 }
 0x73c   : > { %s3591_s16 = smov %s2646_s17  ;;  %s3592_s17 = smov %s2851_s13 }
 0x73d   : > { %s3593_s18 = smov %s2841_s11  ;;  %21 = sbr.rel (!%p19_p4) target bundleno = 7 (0x7), region = 93 }
 0x744   :  { %2182 = vsyncpa [#allocation3], 1 }
 0x745   :  { %2184 = vsyncpa [#allocation3 + $0x1], 1 }
 0x746   :  { %2185 = vsyncpa [#allocation6], 1 }
 0x747   :  { %2186 = vsyncpa [#allocation9], 1 }
 0x748   :  { %2187 = vsyncpa [#allocation4], 1 }
 0x749   :  { %2189 = vsyncpa [#allocation4 + $0x1], 1 }

</bundles_post_ra>
